<compile_context>
chip_gen: v5e
topology: v5e:2x2
jax: 0.10.0
libtpu: 0.0.40
codegen_flags: <defaults>
</compile_context>

<pallas_src>
import math

import jax
import jax.numpy as jnp
from jax.experimental import pallas as pl
from jax.experimental.pallas import tpu as pltpu

# ----- model / problem sizes (small, consistent with the module) -----
B, S, D_IN = 2, 8, 16
D_MODEL, N_HEADS, N_LAYERS, FFN, D_OUT = 32, 4, 2, 64, 5
HEAD_DIM = D_MODEL // N_HEADS
ROWS = B * S                      # batch folded into the row axis
EPS = 1e-5                        # nn.LayerNorm default
VEC_W = 128                       # lane width of the packed per-layer vector slab
D_OUT_PAD = 128                   # lane-dense output slab width (sliced outside)
NEG_INF = -1e9                    # cross-batch block-diagonal mask value

# row indices inside the packed per-layer vector slab (L, 8, VEC_W)
_BQKV, _BO, _B1, _B2, _LN1G, _LN1B, _LN2G, _LN2B = range(8)


def _layer_norm(x, g, b):
    mu = jnp.mean(x, axis=-1, keepdims=True)
    xc = x - mu
    var = jnp.mean(xc * xc, axis=-1, keepdims=True)   # biased variance (torch LayerNorm)
    return xc * jax.lax.rsqrt(var + EPS) * g + b


def encoder_kernel(x_ref, bias_ref, win_ref, wqkv_ref, wo_ref, w1_ref, w2_ref,
                   vecs_ref, wout_ref, out_ref):
    # Additive attention bias (float key_padding_mask quirk + -1e9 cross-batch
    # block diagonal), precomputed in the wrapper; loaded ONCE, reused by every
    # (layer, head).
    attn_bias = bias_ref[...]                                  # (ROWS, ROWS)

    # input projection; bias is the last row of the packed weight
    wi = win_ref[...]                                          # (D_IN+1, D_MODEL)
    h = (jnp.dot(x_ref[...], wi[:D_IN, :], preferred_element_type=jnp.float32)
         + wi[D_IN:, :])

    for l in range(N_LAYERS):
        vl = vecs_ref[l]                                       # (8, VEC_W)
        bqkv = vl[_BQKV:_BQKV + 1, :3 * D_MODEL]
        bo   = vl[_BO:_BO + 1,     :D_MODEL]
        b1   = vl[_B1:_B1 + 1,     :FFN]
        b2   = vl[_B2:_B2 + 1,     :D_MODEL]
        ln1g = vl[_LN1G:_LN1G + 1, :D_MODEL]
        ln1b = vl[_LN1B:_LN1B + 1, :D_MODEL]
        ln2g = vl[_LN2G:_LN2G + 1, :D_MODEL]
        ln2b = vl[_LN2B:_LN2B + 1, :D_MODEL]

        # ---- fused QKV projection: one (ROWS, D) @ (D, 3D) matmul ----
        qkv = jnp.dot(h, wqkv_ref[l], preferred_element_type=jnp.float32) + bqkv
        q = qkv[:, :D_MODEL]                 # 1/sqrt(head_dim) pre-folded into Wq/bq
        k = qkv[:, D_MODEL:2 * D_MODEL]
        v = qkv[:, 2 * D_MODEL:]
        wo_l = wo_ref[l]                     # (D_MODEL, D_MODEL)

        # ---- batch-folded attention (block-diagonal bias keeps batches
        # independent); per-head outputs accumulate straight into out-proj ----
        attn = None
        for hh in range(N_HEADS):
            c0 = hh * HEAD_DIM
            qh = q[:, c0:c0 + HEAD_DIM]                        # (ROWS, HD)
            kh = k[:, c0:c0 + HEAD_DIM]
            vh = v[:, c0:c0 + HEAD_DIM]
            # scores = q @ k^T with explicit f32 accumulation
            s = jax.lax.dot_general(qh, kh, (((1,), (1,)), ((), ())),
                                    preferred_element_type=jnp.float32)
            s = s + attn_bias
            s = s - jnp.max(s, axis=-1, keepdims=True)
            p = jnp.exp(s)
            p = p * pl.reciprocal(jnp.sum(p, axis=-1, keepdims=True), approx=False)
            ho = jnp.dot(p, vh, preferred_element_type=jnp.float32)   # (ROWS, HD)
            contrib = jnp.dot(ho, wo_l[c0:c0 + HEAD_DIM, :],
                              preferred_element_type=jnp.float32)     # (ROWS, D)
            attn = contrib if attn is None else attn + contrib
        attn = attn + bo
        # TODO(synk): nn.Dropout is identity in eval mode; no stochastic path here.
        h = _layer_norm(h + attn, ln1g, ln1b)

        # ---- feed-forward ----
        f = jnp.dot(h, w1_ref[l], preferred_element_type=jnp.float32) + b1
        f = jnp.maximum(f, 0.0)
        f = jnp.dot(f, w2_ref[l], preferred_element_type=jnp.float32) + b2
        h = _layer_norm(h + f, ln2g, ln2b)

    # output projection into a lane-dense (ROWS, 128) slab (bias = last row)
    wp = wout_ref[...]
    out = (jnp.dot(h, wp[:D_MODEL, :], preferred_element_type=jnp.float32)
           + wp[D_MODEL:, :])
    out_ref[...] = out.astype(out_ref.dtype)


def init_params(key):
    """Deterministic synthetic parameters, pre-packed lane-dense for the kernel."""
    ks = list(jax.random.split(key, 12))

    def nrm(k, shape, scale=0.05):
        return (scale * jax.random.normal(k, shape)).astype(jnp.float32)

    # input projection nn.Linear(D_IN, D_MODEL): weight (pre-transposed) + bias row
    win = nrm(ks[0], (D_IN, D_MODEL))
    bin_ = nrm(ks[1], (1, D_MODEL))
    win_pack = jnp.concatenate([win, bin_], axis=0)             # (D_IN+1, D_MODEL)

    # fused in_proj (Wq|Wk|Wv) per layer, input-major
    wqkv = nrm(ks[2], (N_LAYERS, D_MODEL, 3 * D_MODEL))
    bqkv = nrm(ks[3], (N_LAYERS, 3 * D_MODEL))
    # F.multi_head_attention_forward scales q AFTER adding the bias, so folding
    # 1/sqrt(head_dim) into both Wq and bq is exact.
    scale = 1.0 / math.sqrt(HEAD_DIM)
    wqkv = wqkv.at[:, :, :D_MODEL].multiply(scale)
    bqkv = bqkv.at[:, :D_MODEL].multiply(scale)

    wo = nrm(ks[4], (N_LAYERS, D_MODEL, D_MODEL))               # attention out_proj
    bo = nrm(ks[5], (N_LAYERS, D_MODEL))
    w1 = nrm(ks[6], (N_LAYERS, D_MODEL, FFN))                   # FFN Linear 1
    b1 = nrm(ks[7], (N_LAYERS, FFN))
    w2 = nrm(ks[8], (N_LAYERS, FFN, D_MODEL))                   # FFN Linear 2
    b2 = nrm(ks[9], (N_LAYERS, D_MODEL))
    ln1g = jnp.ones((N_LAYERS, D_MODEL), jnp.float32)
    ln1b = jnp.zeros((N_LAYERS, D_MODEL), jnp.float32)
    ln2g = jnp.ones((N_LAYERS, D_MODEL), jnp.float32)
    ln2b = jnp.zeros((N_LAYERS, D_MODEL), jnp.float32)

    def row(v):   # (L, w) -> (L, 1, VEC_W) lane-padded (all slices start at lane 0)
        return jnp.pad(v, ((0, 0), (0, VEC_W - v.shape[-1])))[:, None, :]

    vecs = jnp.concatenate(
        [row(bqkv), row(bo), row(b1), row(b2),
         row(ln1g), row(ln1b), row(ln2g), row(ln2b)], axis=1)   # (L, 8, 128)

    # output layer nn.Linear(D_MODEL, D_OUT): pack weight+bias, pad to 128 lanes
    wout = nrm(ks[10], (D_MODEL, D_OUT))
    bout = nrm(ks[11], (1, D_OUT))
    wout_pack = jnp.pad(jnp.concatenate([wout, bout], axis=0),
                        ((0, 0), (0, D_OUT_PAD - D_OUT)))       # (D_MODEL+1, 128)

    return {"win_pack": win_pack, "wqkv": wqkv, "wo": wo, "w1": w1, "w2": w2,
            "vecs": vecs, "wout_pack": wout_pack}


def encoder_forward(x, params):
    # create_padding_matrix: 1.0 where the feature row-sum is non-zero, else 0.0.
    valid = (jnp.sum(x, axis=-1) != 0).astype(jnp.float32)          # (B, S)

    # Full additive attention bias, built ONCE:
    #   same-batch entries: the float key_padding_mask quirk value of the key
    #   (+1.0 valid, +0.0 padded -- PyTorch ADDS a float mask to the logits);
    #   cross-batch entries: -1e9 so the batch-folded softmax stays block-diagonal.
    same_batch = jnp.equal(jnp.arange(B)[:, None, None, None],
                           jnp.arange(B)[None, None, :, None])       # (B,1,B,1)
    kp = jnp.broadcast_to(valid[None, None, :, :], (B, 1, B, S))     # key quirk value
    bias = jnp.where(same_batch, kp, NEG_INF)                        # (B,1,B,S)
    bias = jnp.broadcast_to(bias, (B, S, B, S)).reshape(ROWS, ROWS)

    # fold batch into rows (bias add happens in-kernel; no ones-column fold)
    x2d = x.reshape(ROWS, D_IN)

    weight_names = ["win_pack", "wqkv", "wo", "w1", "w2", "vecs", "wout_pack"]
    weights = [params[n] for n in weight_names]

    def full_spec(a):
        nd = a.ndim
        return pl.BlockSpec(a.shape, lambda g, _nd=nd: (0,) * _nd)

    in_specs = [
        pl.BlockSpec((ROWS, D_IN), lambda g: (0, 0)),     # folded input rows
        pl.BlockSpec((ROWS, ROWS), lambda g: (0, 0)),     # additive attention bias
    ] + [full_spec(a) for a in weights]

    out_spec = pl.BlockSpec((ROWS, D_OUT_PAD), lambda g: (0, 0))

    # Single grid step on all generations: the whole problem is 16 rows, so any
    # grid split only adds per-step overhead and halves sublane fill.
    out2d = pl.pallas_call(
        encoder_kernel,
        out_shape=jax.ShapeDtypeStruct((ROWS, D_OUT_PAD), jnp.float32),
        grid=(1,),
        in_specs=in_specs,
        out_specs=out_spec,
        compiler_params=pltpu.CompilerParams(
            dimension_semantics=("arbitrary",)),
    )(x2d, bias, *weights)

    # slice the lane-dense slab back to the real output width
    return out2d[:, :D_OUT].reshape(B, S, D_OUT)


if __name__ == "__main__":
    key = jax.random.PRNGKey(0)
    kx, kp = jax.random.split(key)
    x = jax.random.normal(kx, (B, S, D_IN), dtype=jnp.float32)
    # make one sequence position all-zero so the padding-mask path is exercised
    x = x.at[1, S - 1, :].set(0.0)

    params = init_params(kp)
    out = encoder_forward(x, params)
    jax.block_until_ready(out)

    assert out.shape == (B, S, D_OUT), out.shape
    assert bool(jnp.all(jnp.isfinite(out)))
    print("KERNEL_OK")
</pallas_src>

<mosaic_0001>
module attributes {stable_mosaic.version = 11 : i64} {
  func.func @encoder_kernel(%arg0: i32, %arg1: memref<16x16xf32, #tpu.memory_space<vmem>>, %arg2: memref<16x16xf32, #tpu.memory_space<vmem>>, %arg3: memref<17x32xf32, #tpu.memory_space<vmem>>, %arg4: memref<2x32x96xf32, #tpu.memory_space<vmem>>, %arg5: memref<2x32x32xf32, #tpu.memory_space<vmem>>, %arg6: memref<2x32x64xf32, #tpu.memory_space<vmem>>, %arg7: memref<2x64x32xf32, #tpu.memory_space<vmem>>, %arg8: memref<2x8x128xf32, #tpu.memory_space<vmem>>, %arg9: memref<33x128xf32, #tpu.memory_space<vmem>>, %arg10: memref<16x128xf32, #tpu.memory_space<vmem>>) attributes {dimension_semantics = [#tpu.dimension_semantics<arbitrary>], iteration_bounds = array<i64: 1>, scalar_prefetch = 0 : i64, scratch_operands = 0 : i64, tpu.core_type = #tpu.core_type<tc>, window_params = [{pipeline_mode = #tpu.pipeline_mode<synchronous>, transform_indices = @transform_0, window_bounds = array<i64: 16, 16>}, {pipeline_mode = #tpu.pipeline_mode<synchronous>, transform_indices = @transform_1, window_bounds = array<i64: 16, 16>}, {pipeline_mode = #tpu.pipeline_mode<synchronous>, transform_indices = @transform_2, window_bounds = array<i64: 17, 32>}, {pipeline_mode = #tpu.pipeline_mode<synchronous>, transform_indices = @transform_3, window_bounds = array<i64: 2, 32, 96>}, {pipeline_mode = #tpu.pipeline_mode<synchronous>, transform_indices = @transform_4, window_bounds = array<i64: 2, 32, 32>}, {pipeline_mode = #tpu.pipeline_mode<synchronous>, transform_indices = @transform_5, window_bounds = array<i64: 2, 32, 64>}, {pipeline_mode = #tpu.pipeline_mode<synchronous>, transform_indices = @transform_6, window_bounds = array<i64: 2, 64, 32>}, {pipeline_mode = #tpu.pipeline_mode<synchronous>, transform_indices = @transform_7, window_bounds = array<i64: 2, 8, 128>}, {pipeline_mode = #tpu.pipeline_mode<synchronous>, transform_indices = @transform_8, window_bounds = array<i64: 33, 128>}, {pipeline_mode = #tpu.pipeline_mode<synchronous>, transform_indices = @transform_9, window_bounds = array<i64: 16, 128>}]} {
    %c0 = arith.constant 0 : index
    %c0_0 = arith.constant 0 : index
    %0 = vector.load %arg2[%c0, %c0_0] : memref<16x16xf32, #tpu.memory_space<vmem>>, vector<16x16xf32>
    %c0_1 = arith.constant 0 : index
    %c0_2 = arith.constant 0 : index
    %1 = vector.load %arg3[%c0_1, %c0_2] : memref<17x32xf32, #tpu.memory_space<vmem>>, vector<17x32xf32>
    %c0_3 = arith.constant 0 : index
    %c0_4 = arith.constant 0 : index
    %2 = vector.load %arg1[%c0_3, %c0_4] : memref<16x16xf32, #tpu.memory_space<vmem>>, vector<16x16xf32>
    %3 = vector.extract_strided_slice %1 {offsets = [0, 0], sizes = [16, 32], strides = [1, 1]} : vector<17x32xf32> to vector<16x32xf32>
    %cst = arith.constant dense<0.000000e+00> : vector<16x32xf32>
    %4 = tpu.matmul %2, %3, %cst {dimension_numbers = #tpu.dot_dimension_numbers<[1], [0], [0], [1], [0, 0, 1, 1], [], []>} : vector<16x16xf32>, vector<16x32xf32>, vector<16x32xf32> -> vector<16x32xf32>
    %5 = vector.extract_strided_slice %1 {offsets = [16, 0], sizes = [1, 32], strides = [1, 1]} : vector<17x32xf32> to vector<1x32xf32>
    %6 = vector.broadcast %5 : vector<1x32xf32> to vector<16x32xf32>
    %7 = arith.addf %4, %6 : vector<16x32xf32>
    %c0_5 = arith.constant 0 : index
    %c0_6 = arith.constant 0 : index
    %c0_7 = arith.constant 0 : index
    %8 = vector.load %arg8[%c0_5, %c0_6, %c0_7] : memref<2x8x128xf32, #tpu.memory_space<vmem>>, vector<1x8x128xf32>
    %9 = vector.shape_cast %8 : vector<1x8x128xf32> to vector<8x128xf32>
    %10 = vector.extract_strided_slice %9 {offsets = [0, 0], sizes = [1, 96], strides = [1, 1]} : vector<8x128xf32> to vector<1x96xf32>
    %11 = vector.extract_strided_slice %9 {offsets = [1, 0], sizes = [1, 32], strides = [1, 1]} : vector<8x128xf32> to vector<1x32xf32>
    %12 = vector.extract_strided_slice %9 {offsets = [2, 0], sizes = [1, 64], strides = [1, 1]} : vector<8x128xf32> to vector<1x64xf32>
    %13 = vector.extract_strided_slice %9 {offsets = [3, 0], sizes = [1, 32], strides = [1, 1]} : vector<8x128xf32> to vector<1x32xf32>
    %14 = vector.extract_strided_slice %9 {offsets = [4, 0], sizes = [1, 32], strides = [1, 1]} : vector<8x128xf32> to vector<1x32xf32>
    %15 = vector.extract_strided_slice %9 {offsets = [5, 0], sizes = [1, 32], strides = [1, 1]} : vector<8x128xf32> to vector<1x32xf32>
    %16 = vector.extract_strided_slice %9 {offsets = [6, 0], sizes = [1, 32], strides = [1, 1]} : vector<8x128xf32> to vector<1x32xf32>
    %17 = vector.extract_strided_slice %9 {offsets = [7, 0], sizes = [1, 32], strides = [1, 1]} : vector<8x128xf32> to vector<1x32xf32>
    %c0_8 = arith.constant 0 : index
    %c0_9 = arith.constant 0 : index
    %c0_10 = arith.constant 0 : index
    %18 = vector.load %arg4[%c0_8, %c0_9, %c0_10] : memref<2x32x96xf32, #tpu.memory_space<vmem>>, vector<1x32x96xf32>
    %19 = vector.shape_cast %18 : vector<1x32x96xf32> to vector<32x96xf32>
    %cst_11 = arith.constant dense<0.000000e+00> : vector<16x96xf32>
    %20 = tpu.matmul %7, %19, %cst_11 {dimension_numbers = #tpu.dot_dimension_numbers<[1], [0], [0], [1], [0, 0, 1, 1], [], []>} : vector<16x32xf32>, vector<32x96xf32>, vector<16x96xf32> -> vector<16x96xf32>
    %21 = vector.broadcast %10 : vector<1x96xf32> to vector<16x96xf32>
    %22 = arith.addf %20, %21 : vector<16x96xf32>
    %23 = vector.extract_strided_slice %22 {offsets = [0, 0], sizes = [16, 32], strides = [1, 1]} : vector<16x96xf32> to vector<16x32xf32>
    %24 = vector.extract_strided_slice %22 {offsets = [0, 32], sizes = [16, 32], strides = [1, 1]} : vector<16x96xf32> to vector<16x32xf32>
    %25 = vector.extract_strided_slice %22 {offsets = [0, 64], sizes = [16, 32], strides = [1, 1]} : vector<16x96xf32> to vector<16x32xf32>
    %c0_12 = arith.constant 0 : index
    %c0_13 = arith.constant 0 : index
    %c0_14 = arith.constant 0 : index
    %26 = vector.load %arg5[%c0_12, %c0_13, %c0_14] : memref<2x32x32xf32, #tpu.memory_space<vmem>>, vector<1x32x32xf32>
    %27 = vector.shape_cast %26 : vector<1x32x32xf32> to vector<32x32xf32>
    %28 = vector.extract_strided_slice %23 {offsets = [0, 0], sizes = [16, 8], strides = [1, 1]} : vector<16x32xf32> to vector<16x8xf32>
    %29 = vector.extract_strided_slice %24 {offsets = [0, 0], sizes = [16, 8], strides = [1, 1]} : vector<16x32xf32> to vector<16x8xf32>
    %30 = vector.extract_strided_slice %25 {offsets = [0, 0], sizes = [16, 8], strides = [1, 1]} : vector<16x32xf32> to vector<16x8xf32>
    %cst_15 = arith.constant dense<0.000000e+00> : vector<16x16xf32>
    %31 = tpu.matmul %28, %29, %cst_15 {dimension_numbers = #tpu.dot_dimension_numbers<[1], [1], [0], [0], [0, 0, 1, 0], [], []>} : vector<16x8xf32>, vector<16x8xf32>, vector<16x16xf32> -> vector<16x16xf32>
    %32 = arith.addf %31, %0 : vector<16x16xf32>
    %cst_16 = arith.constant dense<0xFF800000> : vector<16xf32>
    %33 = vector.multi_reduction <maximumf>, %32, %cst_16 [1] : vector<16x16xf32> to vector<16xf32>
    %34 = vector.shape_cast %33 : vector<16xf32> to vector<16x1xf32>
    %35 = vector.broadcast %34 : vector<16x1xf32> to vector<16x16xf32>
    %36 = arith.subf %32, %35 : vector<16x16xf32>
    %37 = math.exp %36 : vector<16x16xf32>
    %cst_17 = arith.constant dense<0.000000e+00> : vector<16xf32>
    %38 = vector.multi_reduction <add>, %37, %cst_17 [1] : vector<16x16xf32> to vector<16xf32>
    %39 = vector.shape_cast %38 : vector<16xf32> to vector<16x1xf32>
    %40 = tpu.reciprocal %39 : vector<16x1xf32> -> vector<16x1xf32>
    %41 = vector.broadcast %40 : vector<16x1xf32> to vector<16x16xf32>
    %42 = arith.mulf %37, %41 : vector<16x16xf32>
    %cst_18 = arith.constant dense<0.000000e+00> : vector<16x8xf32>
    %43 = tpu.matmul %42, %30, %cst_18 {dimension_numbers = #tpu.dot_dimension_numbers<[1], [0], [0], [1], [0, 0, 1, 1], [], []>} : vector<16x16xf32>, vector<16x8xf32>, vector<16x8xf32> -> vector<16x8xf32>
    %44 = vector.extract_strided_slice %27 {offsets = [0, 0], sizes = [8, 32], strides = [1, 1]} : vector<32x32xf32> to vector<8x32xf32>
    %cst_19 = arith.constant dense<0.000000e+00> : vector<16x32xf32>
    %45 = tpu.matmul %43, %44, %cst_19 {dimension_numbers = #tpu.dot_dimension_numbers<[1], [0], [0], [1], [0, 0, 1, 1], [], []>} : vector<16x8xf32>, vector<8x32xf32>, vector<16x32xf32> -> vector<16x32xf32>
    %46 = vector.extract_strided_slice %23 {offsets = [0, 8], sizes = [16, 8], strides = [1, 1]} : vector<16x32xf32> to vector<16x8xf32>
    %47 = vector.extract_strided_slice %24 {offsets = [0, 8], sizes = [16, 8], strides = [1, 1]} : vector<16x32xf32> to vector<16x8xf32>
    %48 = vector.extract_strided_slice %25 {offsets = [0, 8], sizes = [16, 8], strides = [1, 1]} : vector<16x32xf32> to vector<16x8xf32>
    %cst_20 = arith.constant dense<0.000000e+00> : vector<16x16xf32>
    %49 = tpu.matmul %46, %47, %cst_20 {dimension_numbers = #tpu.dot_dimension_numbers<[1], [1], [0], [0], [0, 0, 1, 0], [], []>} : vector<16x8xf32>, vector<16x8xf32>, vector<16x16xf32> -> vector<16x16xf32>
    %50 = arith.addf %49, %0 : vector<16x16xf32>
    %cst_21 = arith.constant dense<0xFF800000> : vector<16xf32>
    %51 = vector.multi_reduction <maximumf>, %50, %cst_21 [1] : vector<16x16xf32> to vector<16xf32>
    %52 = vector.shape_cast %51 : vector<16xf32> to vector<16x1xf32>
    %53 = vector.broadcast %52 : vector<16x1xf32> to vector<16x16xf32>
    %54 = arith.subf %50, %53 : vector<16x16xf32>
    %55 = math.exp %54 : vector<16x16xf32>
    %cst_22 = arith.constant dense<0.000000e+00> : vector<16xf32>
    %56 = vector.multi_reduction <add>, %55, %cst_22 [1] : vector<16x16xf32> to vector<16xf32>
    %57 = vector.shape_cast %56 : vector<16xf32> to vector<16x1xf32>
    %58 = tpu.reciprocal %57 : vector<16x1xf32> -> vector<16x1xf32>
    %59 = vector.broadcast %58 : vector<16x1xf32> to vector<16x16xf32>
    %60 = arith.mulf %55, %59 : vector<16x16xf32>
    %cst_23 = arith.constant dense<0.000000e+00> : vector<16x8xf32>
    %61 = tpu.matmul %60, %48, %cst_23 {dimension_numbers = #tpu.dot_dimension_numbers<[1], [0], [0], [1], [0, 0, 1, 1], [], []>} : vector<16x16xf32>, vector<16x8xf32>, vector<16x8xf32> -> vector<16x8xf32>
    %62 = vector.extract_strided_slice %27 {offsets = [8, 0], sizes = [8, 32], strides = [1, 1]} : vector<32x32xf32> to vector<8x32xf32>
    %cst_24 = arith.constant dense<0.000000e+00> : vector<16x32xf32>
    %63 = tpu.matmul %61, %62, %cst_24 {dimension_numbers = #tpu.dot_dimension_numbers<[1], [0], [0], [1], [0, 0, 1, 1], [], []>} : vector<16x8xf32>, vector<8x32xf32>, vector<16x32xf32> -> vector<16x32xf32>
    %64 = arith.addf %45, %63 : vector<16x32xf32>
    %65 = vector.extract_strided_slice %23 {offsets = [0, 16], sizes = [16, 8], strides = [1, 1]} : vector<16x32xf32> to vector<16x8xf32>
    %66 = vector.extract_strided_slice %24 {offsets = [0, 16], sizes = [16, 8], strides = [1, 1]} : vector<16x32xf32> to vector<16x8xf32>
    %67 = vector.extract_strided_slice %25 {offsets = [0, 16], sizes = [16, 8], strides = [1, 1]} : vector<16x32xf32> to vector<16x8xf32>
    %cst_25 = arith.constant dense<0.000000e+00> : vector<16x16xf32>
    %68 = tpu.matmul %65, %66, %cst_25 {dimension_numbers = #tpu.dot_dimension_numbers<[1], [1], [0], [0], [0, 0, 1, 0], [], []>} : vector<16x8xf32>, vector<16x8xf32>, vector<16x16xf32> -> vector<16x16xf32>
    %69 = arith.addf %68, %0 : vector<16x16xf32>
    %cst_26 = arith.constant dense<0xFF800000> : vector<16xf32>
    %70 = vector.multi_reduction <maximumf>, %69, %cst_26 [1] : vector<16x16xf32> to vector<16xf32>
    %71 = vector.shape_cast %70 : vector<16xf32> to vector<16x1xf32>
    %72 = vector.broadcast %71 : vector<16x1xf32> to vector<16x16xf32>
    %73 = arith.subf %69, %72 : vector<16x16xf32>
    %74 = math.exp %73 : vector<16x16xf32>
    %cst_27 = arith.constant dense<0.000000e+00> : vector<16xf32>
    %75 = vector.multi_reduction <add>, %74, %cst_27 [1] : vector<16x16xf32> to vector<16xf32>
    %76 = vector.shape_cast %75 : vector<16xf32> to vector<16x1xf32>
    %77 = tpu.reciprocal %76 : vector<16x1xf32> -> vector<16x1xf32>
    %78 = vector.broadcast %77 : vector<16x1xf32> to vector<16x16xf32>
    %79 = arith.mulf %74, %78 : vector<16x16xf32>
    %cst_28 = arith.constant dense<0.000000e+00> : vector<16x8xf32>
    %80 = tpu.matmul %79, %67, %cst_28 {dimension_numbers = #tpu.dot_dimension_numbers<[1], [0], [0], [1], [0, 0, 1, 1], [], []>} : vector<16x16xf32>, vector<16x8xf32>, vector<16x8xf32> -> vector<16x8xf32>
    %81 = vector.extract_strided_slice %27 {offsets = [16, 0], sizes = [8, 32], strides = [1, 1]} : vector<32x32xf32> to vector<8x32xf32>
    %cst_29 = arith.constant dense<0.000000e+00> : vector<16x32xf32>
    %82 = tpu.matmul %80, %81, %cst_29 {dimension_numbers = #tpu.dot_dimension_numbers<[1], [0], [0], [1], [0, 0, 1, 1], [], []>} : vector<16x8xf32>, vector<8x32xf32>, vector<16x32xf32> -> vector<16x32xf32>
    %83 = arith.addf %64, %82 : vector<16x32xf32>
    %84 = vector.extract_strided_slice %23 {offsets = [0, 24], sizes = [16, 8], strides = [1, 1]} : vector<16x32xf32> to vector<16x8xf32>
    %85 = vector.extract_strided_slice %24 {offsets = [0, 24], sizes = [16, 8], strides = [1, 1]} : vector<16x32xf32> to vector<16x8xf32>
    %86 = vector.extract_strided_slice %25 {offsets = [0, 24], sizes = [16, 8], strides = [1, 1]} : vector<16x32xf32> to vector<16x8xf32>
    %cst_30 = arith.constant dense<0.000000e+00> : vector<16x16xf32>
    %87 = tpu.matmul %84, %85, %cst_30 {dimension_numbers = #tpu.dot_dimension_numbers<[1], [1], [0], [0], [0, 0, 1, 0], [], []>} : vector<16x8xf32>, vector<16x8xf32>, vector<16x16xf32> -> vector<16x16xf32>
    %88 = arith.addf %87, %0 : vector<16x16xf32>
    %cst_31 = arith.constant dense<0xFF800000> : vector<16xf32>
    %89 = vector.multi_reduction <maximumf>, %88, %cst_31 [1] : vector<16x16xf32> to vector<16xf32>
    %90 = vector.shape_cast %89 : vector<16xf32> to vector<16x1xf32>
    %91 = vector.broadcast %90 : vector<16x1xf32> to vector<16x16xf32>
    %92 = arith.subf %88, %91 : vector<16x16xf32>
    %93 = math.exp %92 : vector<16x16xf32>
    %cst_32 = arith.constant dense<0.000000e+00> : vector<16xf32>
    %94 = vector.multi_reduction <add>, %93, %cst_32 [1] : vector<16x16xf32> to vector<16xf32>
    %95 = vector.shape_cast %94 : vector<16xf32> to vector<16x1xf32>
    %96 = tpu.reciprocal %95 : vector<16x1xf32> -> vector<16x1xf32>
    %97 = vector.broadcast %96 : vector<16x1xf32> to vector<16x16xf32>
    %98 = arith.mulf %93, %97 : vector<16x16xf32>
    %cst_33 = arith.constant dense<0.000000e+00> : vector<16x8xf32>
    %99 = tpu.matmul %98, %86, %cst_33 {dimension_numbers = #tpu.dot_dimension_numbers<[1], [0], [0], [1], [0, 0, 1, 1], [], []>} : vector<16x16xf32>, vector<16x8xf32>, vector<16x8xf32> -> vector<16x8xf32>
    %100 = vector.extract_strided_slice %27 {offsets = [24, 0], sizes = [8, 32], strides = [1, 1]} : vector<32x32xf32> to vector<8x32xf32>
    %cst_34 = arith.constant dense<0.000000e+00> : vector<16x32xf32>
    %101 = tpu.matmul %99, %100, %cst_34 {dimension_numbers = #tpu.dot_dimension_numbers<[1], [0], [0], [1], [0, 0, 1, 1], [], []>} : vector<16x8xf32>, vector<8x32xf32>, vector<16x32xf32> -> vector<16x32xf32>
    %102 = arith.addf %83, %101 : vector<16x32xf32>
    %103 = vector.broadcast %11 : vector<1x32xf32> to vector<16x32xf32>
    %104 = arith.addf %102, %103 : vector<16x32xf32>
    %105 = arith.addf %7, %104 : vector<16x32xf32>
    %cst_35 = arith.constant dense<0.000000e+00> : vector<16xf32>
    %106 = vector.multi_reduction <add>, %105, %cst_35 [1] : vector<16x32xf32> to vector<16xf32>
    %107 = vector.shape_cast %106 : vector<16xf32> to vector<16x1xf32>
    %cst_36 = arith.constant 3.200000e+01 : f32
    %108 = vector.broadcast %cst_36 : f32 to vector<16x1xf32>
    %109 = arith.divf %107, %108 : vector<16x1xf32>
    %110 = vector.broadcast %109 : vector<16x1xf32> to vector<16x32xf32>
    %111 = arith.subf %105, %110 : vector<16x32xf32>
    %112 = arith.mulf %111, %111 : vector<16x32xf32>
    %cst_37 = arith.constant dense<0.000000e+00> : vector<16xf32>
    %113 = vector.multi_reduction <add>, %112, %cst_37 [1] : vector<16x32xf32> to vector<16xf32>
    %114 = vector.shape_cast %113 : vector<16xf32> to vector<16x1xf32>
    %cst_38 = arith.constant 3.200000e+01 : f32
    %115 = vector.broadcast %cst_38 : f32 to vector<16x1xf32>
    %116 = arith.divf %114, %115 : vector<16x1xf32>
    %cst_39 = arith.constant 9.99999974E-6 : f32
    %117 = vector.broadcast %cst_39 : f32 to vector<16x1xf32>
    %118 = arith.addf %116, %117 : vector<16x1xf32>
    %119 = math.rsqrt %118 : vector<16x1xf32>
    %120 = vector.broadcast %119 : vector<16x1xf32> to vector<16x32xf32>
    %121 = arith.mulf %111, %120 : vector<16x32xf32>
    %122 = vector.broadcast %14 : vector<1x32xf32> to vector<16x32xf32>
    %123 = arith.mulf %121, %122 : vector<16x32xf32>
    %124 = vector.broadcast %15 : vector<1x32xf32> to vector<16x32xf32>
    %125 = arith.addf %123, %124 : vector<16x32xf32>
    %c0_40 = arith.constant 0 : index
    %c0_41 = arith.constant 0 : index
    %c0_42 = arith.constant 0 : index
    %126 = vector.load %arg6[%c0_40, %c0_41, %c0_42] : memref<2x32x64xf32, #tpu.memory_space<vmem>>, vector<1x32x64xf32>
    %127 = vector.shape_cast %126 : vector<1x32x64xf32> to vector<32x64xf32>
    %cst_43 = arith.constant dense<0.000000e+00> : vector<16x64xf32>
    %128 = tpu.matmul %125, %127, %cst_43 {dimension_numbers = #tpu.dot_dimension_numbers<[1], [0], [0], [1], [0, 0, 1, 1], [], []>} : vector<16x32xf32>, vector<32x64xf32>, vector<16x64xf32> -> vector<16x64xf32>
    %129 = vector.broadcast %12 : vector<1x64xf32> to vector<16x64xf32>
    %130 = arith.addf %128, %129 : vector<16x64xf32>
    %cst_44 = arith.constant 0.000000e+00 : f32
    %131 = vector.broadcast %cst_44 : f32 to vector<16x64xf32>
    %132 = arith.maximumf %130, %131 : vector<16x64xf32>
    %c0_45 = arith.constant 0 : index
    %c0_46 = arith.constant 0 : index
    %c0_47 = arith.constant 0 : index
    %133 = vector.load %arg7[%c0_45, %c0_46, %c0_47] : memref<2x64x32xf32, #tpu.memory_space<vmem>>, vector<1x64x32xf32>
    %134 = vector.shape_cast %133 : vector<1x64x32xf32> to vector<64x32xf32>
    %cst_48 = arith.constant dense<0.000000e+00> : vector<16x32xf32>
    %135 = tpu.matmul %132, %134, %cst_48 {dimension_numbers = #tpu.dot_dimension_numbers<[1], [0], [0], [1], [0, 0, 1, 1], [], []>} : vector<16x64xf32>, vector<64x32xf32>, vector<16x32xf32> -> vector<16x32xf32>
    %136 = vector.broadcast %13 : vector<1x32xf32> to vector<16x32xf32>
    %137 = arith.addf %135, %136 : vector<16x32xf32>
    %138 = arith.addf %125, %137 : vector<16x32xf32>
    %cst_49 = arith.constant dense<0.000000e+00> : vector<16xf32>
    %139 = vector.multi_reduction <add>, %138, %cst_49 [1] : vector<16x32xf32> to vector<16xf32>
    %140 = vector.shape_cast %139 : vector<16xf32> to vector<16x1xf32>
    %cst_50 = arith.constant 3.200000e+01 : f32
    %141 = vector.broadcast %cst_50 : f32 to vector<16x1xf32>
    %142 = arith.divf %140, %141 : vector<16x1xf32>
    %143 = vector.broadcast %142 : vector<16x1xf32> to vector<16x32xf32>
    %144 = arith.subf %138, %143 : vector<16x32xf32>
    %145 = arith.mulf %144, %144 : vector<16x32xf32>
    %cst_51 = arith.constant dense<0.000000e+00> : vector<16xf32>
    %146 = vector.multi_reduction <add>, %145, %cst_51 [1] : vector<16x32xf32> to vector<16xf32>
    %147 = vector.shape_cast %146 : vector<16xf32> to vector<16x1xf32>
    %cst_52 = arith.constant 3.200000e+01 : f32
    %148 = vector.broadcast %cst_52 : f32 to vector<16x1xf32>
    %149 = arith.divf %147, %148 : vector<16x1xf32>
    %cst_53 = arith.constant 9.99999974E-6 : f32
    %150 = vector.broadcast %cst_53 : f32 to vector<16x1xf32>
    %151 = arith.addf %149, %150 : vector<16x1xf32>
    %152 = math.rsqrt %151 : vector<16x1xf32>
    %153 = vector.broadcast %152 : vector<16x1xf32> to vector<16x32xf32>
    %154 = arith.mulf %144, %153 : vector<16x32xf32>
    %155 = vector.broadcast %16 : vector<1x32xf32> to vector<16x32xf32>
    %156 = arith.mulf %154, %155 : vector<16x32xf32>
    %157 = vector.broadcast %17 : vector<1x32xf32> to vector<16x32xf32>
    %158 = arith.addf %156, %157 : vector<16x32xf32>
    %c1 = arith.constant 1 : index
    %c0_54 = arith.constant 0 : index
    %c0_55 = arith.constant 0 : index
    %159 = vector.load %arg8[%c1, %c0_54, %c0_55] : memref<2x8x128xf32, #tpu.memory_space<vmem>>, vector<1x8x128xf32>
    %160 = vector.shape_cast %159 : vector<1x8x128xf32> to vector<8x128xf32>
    %161 = vector.extract_strided_slice %160 {offsets = [0, 0], sizes = [1, 96], strides = [1, 1]} : vector<8x128xf32> to vector<1x96xf32>
    %162 = vector.extract_strided_slice %160 {offsets = [1, 0], sizes = [1, 32], strides = [1, 1]} : vector<8x128xf32> to vector<1x32xf32>
    %163 = vector.extract_strided_slice %160 {offsets = [2, 0], sizes = [1, 64], strides = [1, 1]} : vector<8x128xf32> to vector<1x64xf32>
    %164 = vector.extract_strided_slice %160 {offsets = [3, 0], sizes = [1, 32], strides = [1, 1]} : vector<8x128xf32> to vector<1x32xf32>
    %165 = vector.extract_strided_slice %160 {offsets = [4, 0], sizes = [1, 32], strides = [1, 1]} : vector<8x128xf32> to vector<1x32xf32>
    %166 = vector.extract_strided_slice %160 {offsets = [5, 0], sizes = [1, 32], strides = [1, 1]} : vector<8x128xf32> to vector<1x32xf32>
    %167 = vector.extract_strided_slice %160 {offsets = [6, 0], sizes = [1, 32], strides = [1, 1]} : vector<8x128xf32> to vector<1x32xf32>
    %168 = vector.extract_strided_slice %160 {offsets = [7, 0], sizes = [1, 32], strides = [1, 1]} : vector<8x128xf32> to vector<1x32xf32>
    %c1_56 = arith.constant 1 : index
    %c0_57 = arith.constant 0 : index
    %c0_58 = arith.constant 0 : index
    %169 = vector.load %arg4[%c1_56, %c0_57, %c0_58] : memref<2x32x96xf32, #tpu.memory_space<vmem>>, vector<1x32x96xf32>
    %170 = vector.shape_cast %169 : vector<1x32x96xf32> to vector<32x96xf32>
    %cst_59 = arith.constant dense<0.000000e+00> : vector<16x96xf32>
    %171 = tpu.matmul %158, %170, %cst_59 {dimension_numbers = #tpu.dot_dimension_numbers<[1], [0], [0], [1], [0, 0, 1, 1], [], []>} : vector<16x32xf32>, vector<32x96xf32>, vector<16x96xf32> -> vector<16x96xf32>
    %172 = vector.broadcast %161 : vector<1x96xf32> to vector<16x96xf32>
    %173 = arith.addf %171, %172 : vector<16x96xf32>
    %174 = vector.extract_strided_slice %173 {offsets = [0, 0], sizes = [16, 32], strides = [1, 1]} : vector<16x96xf32> to vector<16x32xf32>
    %175 = vector.extract_strided_slice %173 {offsets = [0, 32], sizes = [16, 32], strides = [1, 1]} : vector<16x96xf32> to vector<16x32xf32>
    %176 = vector.extract_strided_slice %173 {offsets = [0, 64], sizes = [16, 32], strides = [1, 1]} : vector<16x96xf32> to vector<16x32xf32>
    %c1_60 = arith.constant 1 : index
    %c0_61 = arith.constant 0 : index
    %c0_62 = arith.constant 0 : index
    %177 = vector.load %arg5[%c1_60, %c0_61, %c0_62] : memref<2x32x32xf32, #tpu.memory_space<vmem>>, vector<1x32x32xf32>
    %178 = vector.shape_cast %177 : vector<1x32x32xf32> to vector<32x32xf32>
    %179 = vector.extract_strided_slice %174 {offsets = [0, 0], sizes = [16, 8], strides = [1, 1]} : vector<16x32xf32> to vector<16x8xf32>
    %180 = vector.extract_strided_slice %175 {offsets = [0, 0], sizes = [16, 8], strides = [1, 1]} : vector<16x32xf32> to vector<16x8xf32>
    %181 = vector.extract_strided_slice %176 {offsets = [0, 0], sizes = [16, 8], strides = [1, 1]} : vector<16x32xf32> to vector<16x8xf32>
    %cst_63 = arith.constant dense<0.000000e+00> : vector<16x16xf32>
    %182 = tpu.matmul %179, %180, %cst_63 {dimension_numbers = #tpu.dot_dimension_numbers<[1], [1], [0], [0], [0, 0, 1, 0], [], []>} : vector<16x8xf32>, vector<16x8xf32>, vector<16x16xf32> -> vector<16x16xf32>
    %183 = arith.addf %182, %0 : vector<16x16xf32>
    %cst_64 = arith.constant dense<0xFF800000> : vector<16xf32>
    %184 = vector.multi_reduction <maximumf>, %183, %cst_64 [1] : vector<16x16xf32> to vector<16xf32>
    %185 = vector.shape_cast %184 : vector<16xf32> to vector<16x1xf32>
    %186 = vector.broadcast %185 : vector<16x1xf32> to vector<16x16xf32>
    %187 = arith.subf %183, %186 : vector<16x16xf32>
    %188 = math.exp %187 : vector<16x16xf32>
    %cst_65 = arith.constant dense<0.000000e+00> : vector<16xf32>
    %189 = vector.multi_reduction <add>, %188, %cst_65 [1] : vector<16x16xf32> to vector<16xf32>
    %190 = vector.shape_cast %189 : vector<16xf32> to vector<16x1xf32>
    %191 = tpu.reciprocal %190 : vector<16x1xf32> -> vector<16x1xf32>
    %192 = vector.broadcast %191 : vector<16x1xf32> to vector<16x16xf32>
    %193 = arith.mulf %188, %192 : vector<16x16xf32>
    %cst_66 = arith.constant dense<0.000000e+00> : vector<16x8xf32>
    %194 = tpu.matmul %193, %181, %cst_66 {dimension_numbers = #tpu.dot_dimension_numbers<[1], [0], [0], [1], [0, 0, 1, 1], [], []>} : vector<16x16xf32>, vector<16x8xf32>, vector<16x8xf32> -> vector<16x8xf32>
    %195 = vector.extract_strided_slice %178 {offsets = [0, 0], sizes = [8, 32], strides = [1, 1]} : vector<32x32xf32> to vector<8x32xf32>
    %cst_67 = arith.constant dense<0.000000e+00> : vector<16x32xf32>
    %196 = tpu.matmul %194, %195, %cst_67 {dimension_numbers = #tpu.dot_dimension_numbers<[1], [0], [0], [1], [0, 0, 1, 1], [], []>} : vector<16x8xf32>, vector<8x32xf32>, vector<16x32xf32> -> vector<16x32xf32>
    %197 = vector.extract_strided_slice %174 {offsets = [0, 8], sizes = [16, 8], strides = [1, 1]} : vector<16x32xf32> to vector<16x8xf32>
    %198 = vector.extract_strided_slice %175 {offsets = [0, 8], sizes = [16, 8], strides = [1, 1]} : vector<16x32xf32> to vector<16x8xf32>
    %199 = vector.extract_strided_slice %176 {offsets = [0, 8], sizes = [16, 8], strides = [1, 1]} : vector<16x32xf32> to vector<16x8xf32>
    %cst_68 = arith.constant dense<0.000000e+00> : vector<16x16xf32>
    %200 = tpu.matmul %197, %198, %cst_68 {dimension_numbers = #tpu.dot_dimension_numbers<[1], [1], [0], [0], [0, 0, 1, 0], [], []>} : vector<16x8xf32>, vector<16x8xf32>, vector<16x16xf32> -> vector<16x16xf32>
    %201 = arith.addf %200, %0 : vector<16x16xf32>
    %cst_69 = arith.constant dense<0xFF800000> : vector<16xf32>
    %202 = vector.multi_reduction <maximumf>, %201, %cst_69 [1] : vector<16x16xf32> to vector<16xf32>
    %203 = vector.shape_cast %202 : vector<16xf32> to vector<16x1xf32>
    %204 = vector.broadcast %203 : vector<16x1xf32> to vector<16x16xf32>
    %205 = arith.subf %201, %204 : vector<16x16xf32>
    %206 = math.exp %205 : vector<16x16xf32>
    %cst_70 = arith.constant dense<0.000000e+00> : vector<16xf32>
    %207 = vector.multi_reduction <add>, %206, %cst_70 [1] : vector<16x16xf32> to vector<16xf32>
    %208 = vector.shape_cast %207 : vector<16xf32> to vector<16x1xf32>
    %209 = tpu.reciprocal %208 : vector<16x1xf32> -> vector<16x1xf32>
    %210 = vector.broadcast %209 : vector<16x1xf32> to vector<16x16xf32>
    %211 = arith.mulf %206, %210 : vector<16x16xf32>
    %cst_71 = arith.constant dense<0.000000e+00> : vector<16x8xf32>
    %212 = tpu.matmul %211, %199, %cst_71 {dimension_numbers = #tpu.dot_dimension_numbers<[1], [0], [0], [1], [0, 0, 1, 1], [], []>} : vector<16x16xf32>, vector<16x8xf32>, vector<16x8xf32> -> vector<16x8xf32>
    %213 = vector.extract_strided_slice %178 {offsets = [8, 0], sizes = [8, 32], strides = [1, 1]} : vector<32x32xf32> to vector<8x32xf32>
    %cst_72 = arith.constant dense<0.000000e+00> : vector<16x32xf32>
    %214 = tpu.matmul %212, %213, %cst_72 {dimension_numbers = #tpu.dot_dimension_numbers<[1], [0], [0], [1], [0, 0, 1, 1], [], []>} : vector<16x8xf32>, vector<8x32xf32>, vector<16x32xf32> -> vector<16x32xf32>
    %215 = arith.addf %196, %214 : vector<16x32xf32>
    %216 = vector.extract_strided_slice %174 {offsets = [0, 16], sizes = [16, 8], strides = [1, 1]} : vector<16x32xf32> to vector<16x8xf32>
    %217 = vector.extract_strided_slice %175 {offsets = [0, 16], sizes = [16, 8], strides = [1, 1]} : vector<16x32xf32> to vector<16x8xf32>
    %218 = vector.extract_strided_slice %176 {offsets = [0, 16], sizes = [16, 8], strides = [1, 1]} : vector<16x32xf32> to vector<16x8xf32>
    %cst_73 = arith.constant dense<0.000000e+00> : vector<16x16xf32>
    %219 = tpu.matmul %216, %217, %cst_73 {dimension_numbers = #tpu.dot_dimension_numbers<[1], [1], [0], [0], [0, 0, 1, 0], [], []>} : vector<16x8xf32>, vector<16x8xf32>, vector<16x16xf32> -> vector<16x16xf32>
    %220 = arith.addf %219, %0 : vector<16x16xf32>
    %cst_74 = arith.constant dense<0xFF800000> : vector<16xf32>
    %221 = vector.multi_reduction <maximumf>, %220, %cst_74 [1] : vector<16x16xf32> to vector<16xf32>
    %222 = vector.shape_cast %221 : vector<16xf32> to vector<16x1xf32>
    %223 = vector.broadcast %222 : vector<16x1xf32> to vector<16x16xf32>
    %224 = arith.subf %220, %223 : vector<16x16xf32>
    %225 = math.exp %224 : vector<16x16xf32>
    %cst_75 = arith.constant dense<0.000000e+00> : vector<16xf32>
    %226 = vector.multi_reduction <add>, %225, %cst_75 [1] : vector<16x16xf32> to vector<16xf32>
    %227 = vector.shape_cast %226 : vector<16xf32> to vector<16x1xf32>
    %228 = tpu.reciprocal %227 : vector<16x1xf32> -> vector<16x1xf32>
    %229 = vector.broadcast %228 : vector<16x1xf32> to vector<16x16xf32>
    %230 = arith.mulf %225, %229 : vector<16x16xf32>
    %cst_76 = arith.constant dense<0.000000e+00> : vector<16x8xf32>
    %231 = tpu.matmul %230, %218, %cst_76 {dimension_numbers = #tpu.dot_dimension_numbers<[1], [0], [0], [1], [0, 0, 1, 1], [], []>} : vector<16x16xf32>, vector<16x8xf32>, vector<16x8xf32> -> vector<16x8xf32>
    %232 = vector.extract_strided_slice %178 {offsets = [16, 0], sizes = [8, 32], strides = [1, 1]} : vector<32x32xf32> to vector<8x32xf32>
    %cst_77 = arith.constant dense<0.000000e+00> : vector<16x32xf32>
    %233 = tpu.matmul %231, %232, %cst_77 {dimension_numbers = #tpu.dot_dimension_numbers<[1], [0], [0], [1], [0, 0, 1, 1], [], []>} : vector<16x8xf32>, vector<8x32xf32>, vector<16x32xf32> -> vector<16x32xf32>
    %234 = arith.addf %215, %233 : vector<16x32xf32>
    %235 = vector.extract_strided_slice %174 {offsets = [0, 24], sizes = [16, 8], strides = [1, 1]} : vector<16x32xf32> to vector<16x8xf32>
    %236 = vector.extract_strided_slice %175 {offsets = [0, 24], sizes = [16, 8], strides = [1, 1]} : vector<16x32xf32> to vector<16x8xf32>
    %237 = vector.extract_strided_slice %176 {offsets = [0, 24], sizes = [16, 8], strides = [1, 1]} : vector<16x32xf32> to vector<16x8xf32>
    %cst_78 = arith.constant dense<0.000000e+00> : vector<16x16xf32>
    %238 = tpu.matmul %235, %236, %cst_78 {dimension_numbers = #tpu.dot_dimension_numbers<[1], [1], [0], [0], [0, 0, 1, 0], [], []>} : vector<16x8xf32>, vector<16x8xf32>, vector<16x16xf32> -> vector<16x16xf32>
    %239 = arith.addf %238, %0 : vector<16x16xf32>
    %cst_79 = arith.constant dense<0xFF800000> : vector<16xf32>
    %240 = vector.multi_reduction <maximumf>, %239, %cst_79 [1] : vector<16x16xf32> to vector<16xf32>
    %241 = vector.shape_cast %240 : vector<16xf32> to vector<16x1xf32>
    %242 = vector.broadcast %241 : vector<16x1xf32> to vector<16x16xf32>
    %243 = arith.subf %239, %242 : vector<16x16xf32>
    %244 = math.exp %243 : vector<16x16xf32>
    %cst_80 = arith.constant dense<0.000000e+00> : vector<16xf32>
    %245 = vector.multi_reduction <add>, %244, %cst_80 [1] : vector<16x16xf32> to vector<16xf32>
    %246 = vector.shape_cast %245 : vector<16xf32> to vector<16x1xf32>
    %247 = tpu.reciprocal %246 : vector<16x1xf32> -> vector<16x1xf32>
    %248 = vector.broadcast %247 : vector<16x1xf32> to vector<16x16xf32>
    %249 = arith.mulf %244, %248 : vector<16x16xf32>
    %cst_81 = arith.constant dense<0.000000e+00> : vector<16x8xf32>
    %250 = tpu.matmul %249, %237, %cst_81 {dimension_numbers = #tpu.dot_dimension_numbers<[1], [0], [0], [1], [0, 0, 1, 1], [], []>} : vector<16x16xf32>, vector<16x8xf32>, vector<16x8xf32> -> vector<16x8xf32>
    %251 = vector.extract_strided_slice %178 {offsets = [24, 0], sizes = [8, 32], strides = [1, 1]} : vector<32x32xf32> to vector<8x32xf32>
    %cst_82 = arith.constant dense<0.000000e+00> : vector<16x32xf32>
    %252 = tpu.matmul %250, %251, %cst_82 {dimension_numbers = #tpu.dot_dimension_numbers<[1], [0], [0], [1], [0, 0, 1, 1], [], []>} : vector<16x8xf32>, vector<8x32xf32>, vector<16x32xf32> -> vector<16x32xf32>
    %253 = arith.addf %234, %252 : vector<16x32xf32>
    %254 = vector.broadcast %162 : vector<1x32xf32> to vector<16x32xf32>
    %255 = arith.addf %253, %254 : vector<16x32xf32>
    %256 = arith.addf %158, %255 : vector<16x32xf32>
    %cst_83 = arith.constant dense<0.000000e+00> : vector<16xf32>
    %257 = vector.multi_reduction <add>, %256, %cst_83 [1] : vector<16x32xf32> to vector<16xf32>
    %258 = vector.shape_cast %257 : vector<16xf32> to vector<16x1xf32>
    %cst_84 = arith.constant 3.200000e+01 : f32
    %259 = vector.broadcast %cst_84 : f32 to vector<16x1xf32>
    %260 = arith.divf %258, %259 : vector<16x1xf32>
    %261 = vector.broadcast %260 : vector<16x1xf32> to vector<16x32xf32>
    %262 = arith.subf %256, %261 : vector<16x32xf32>
    %263 = arith.mulf %262, %262 : vector<16x32xf32>
    %cst_85 = arith.constant dense<0.000000e+00> : vector<16xf32>
    %264 = vector.multi_reduction <add>, %263, %cst_85 [1] : vector<16x32xf32> to vector<16xf32>
    %265 = vector.shape_cast %264 : vector<16xf32> to vector<16x1xf32>
    %cst_86 = arith.constant 3.200000e+01 : f32
    %266 = vector.broadcast %cst_86 : f32 to vector<16x1xf32>
    %267 = arith.divf %265, %266 : vector<16x1xf32>
    %cst_87 = arith.constant 9.99999974E-6 : f32
    %268 = vector.broadcast %cst_87 : f32 to vector<16x1xf32>
    %269 = arith.addf %267, %268 : vector<16x1xf32>
    %270 = math.rsqrt %269 : vector<16x1xf32>
    %271 = vector.broadcast %270 : vector<16x1xf32> to vector<16x32xf32>
    %272 = arith.mulf %262, %271 : vector<16x32xf32>
    %273 = vector.broadcast %165 : vector<1x32xf32> to vector<16x32xf32>
    %274 = arith.mulf %272, %273 : vector<16x32xf32>
    %275 = vector.broadcast %166 : vector<1x32xf32> to vector<16x32xf32>
    %276 = arith.addf %274, %275 : vector<16x32xf32>
    %c1_88 = arith.constant 1 : index
    %c0_89 = arith.constant 0 : index
    %c0_90 = arith.constant 0 : index
    %277 = vector.load %arg6[%c1_88, %c0_89, %c0_90] : memref<2x32x64xf32, #tpu.memory_space<vmem>>, vector<1x32x64xf32>
    %278 = vector.shape_cast %277 : vector<1x32x64xf32> to vector<32x64xf32>
    %cst_91 = arith.constant dense<0.000000e+00> : vector<16x64xf32>
    %279 = tpu.matmul %276, %278, %cst_91 {dimension_numbers = #tpu.dot_dimension_numbers<[1], [0], [0], [1], [0, 0, 1, 1], [], []>} : vector<16x32xf32>, vector<32x64xf32>, vector<16x64xf32> -> vector<16x64xf32>
    %280 = vector.broadcast %163 : vector<1x64xf32> to vector<16x64xf32>
    %281 = arith.addf %279, %280 : vector<16x64xf32>
    %cst_92 = arith.constant 0.000000e+00 : f32
    %282 = vector.broadcast %cst_92 : f32 to vector<16x64xf32>
    %283 = arith.maximumf %281, %282 : vector<16x64xf32>
    %c1_93 = arith.constant 1 : index
    %c0_94 = arith.constant 0 : index
    %c0_95 = arith.constant 0 : index
    %284 = vector.load %arg7[%c1_93, %c0_94, %c0_95] : memref<2x64x32xf32, #tpu.memory_space<vmem>>, vector<1x64x32xf32>
    %285 = vector.shape_cast %284 : vector<1x64x32xf32> to vector<64x32xf32>
    %cst_96 = arith.constant dense<0.000000e+00> : vector<16x32xf32>
    %286 = tpu.matmul %283, %285, %cst_96 {dimension_numbers = #tpu.dot_dimension_numbers<[1], [0], [0], [1], [0, 0, 1, 1], [], []>} : vector<16x64xf32>, vector<64x32xf32>, vector<16x32xf32> -> vector<16x32xf32>
    %287 = vector.broadcast %164 : vector<1x32xf32> to vector<16x32xf32>
    %288 = arith.addf %286, %287 : vector<16x32xf32>
    %289 = arith.addf %276, %288 : vector<16x32xf32>
    %cst_97 = arith.constant dense<0.000000e+00> : vector<16xf32>
    %290 = vector.multi_reduction <add>, %289, %cst_97 [1] : vector<16x32xf32> to vector<16xf32>
    %291 = vector.shape_cast %290 : vector<16xf32> to vector<16x1xf32>
    %cst_98 = arith.constant 3.200000e+01 : f32
    %292 = vector.broadcast %cst_98 : f32 to vector<16x1xf32>
    %293 = arith.divf %291, %292 : vector<16x1xf32>
    %294 = vector.broadcast %293 : vector<16x1xf32> to vector<16x32xf32>
    %295 = arith.subf %289, %294 : vector<16x32xf32>
    %296 = arith.mulf %295, %295 : vector<16x32xf32>
    %cst_99 = arith.constant dense<0.000000e+00> : vector<16xf32>
    %297 = vector.multi_reduction <add>, %296, %cst_99 [1] : vector<16x32xf32> to vector<16xf32>
    %298 = vector.shape_cast %297 : vector<16xf32> to vector<16x1xf32>
    %cst_100 = arith.constant 3.200000e+01 : f32
    %299 = vector.broadcast %cst_100 : f32 to vector<16x1xf32>
    %300 = arith.divf %298, %299 : vector<16x1xf32>
    %cst_101 = arith.constant 9.99999974E-6 : f32
    %301 = vector.broadcast %cst_101 : f32 to vector<16x1xf32>
    %302 = arith.addf %300, %301 : vector<16x1xf32>
    %303 = math.rsqrt %302 : vector<16x1xf32>
    %304 = vector.broadcast %303 : vector<16x1xf32> to vector<16x32xf32>
    %305 = arith.mulf %295, %304 : vector<16x32xf32>
    %306 = vector.broadcast %167 : vector<1x32xf32> to vector<16x32xf32>
    %307 = arith.mulf %305, %306 : vector<16x32xf32>
    %308 = vector.broadcast %168 : vector<1x32xf32> to vector<16x32xf32>
    %309 = arith.addf %307, %308 : vector<16x32xf32>
    %c0_102 = arith.constant 0 : index
    %c0_103 = arith.constant 0 : index
    %310 = vector.load %arg9[%c0_102, %c0_103] : memref<33x128xf32, #tpu.memory_space<vmem>>, vector<33x128xf32>
    %311 = vector.extract_strided_slice %310 {offsets = [0, 0], sizes = [32, 128], strides = [1, 1]} : vector<33x128xf32> to vector<32x128xf32>
    %cst_104 = arith.constant dense<0.000000e+00> : vector<16x128xf32>
    %312 = tpu.matmul %309, %311, %cst_104 {dimension_numbers = #tpu.dot_dimension_numbers<[1], [0], [0], [1], [0, 0, 1, 1], [], []>} : vector<16x32xf32>, vector<32x128xf32>, vector<16x128xf32> -> vector<16x128xf32>
    %313 = vector.extract_strided_slice %310 {offsets = [32, 0], sizes = [1, 128], strides = [1, 1]} : vector<33x128xf32> to vector<1x128xf32>
    %314 = vector.broadcast %313 : vector<1x128xf32> to vector<16x128xf32>
    %315 = arith.addf %312, %314 : vector<16x128xf32>
    %c0_105 = arith.constant 0 : index
    %c0_106 = arith.constant 0 : index
    %316 = vector.load %arg10[%c0_105, %c0_106] : memref<16x128xf32, #tpu.memory_space<vmem>>, vector<16x128xf32>
    tpu.vector_store %arg10[%c0_105, %c0_106], %315 {strides = array<i32>} : memref<16x128xf32, #tpu.memory_space<vmem>>, vector<16x128xf32>,
    return
  }
  func.func @transform_0(%arg0: i32) -> (i32, i32) {
    %c0_i32 = arith.constant 0 : i32
    %c0_i32_0 = arith.constant 0 : i32
    %c0_i32_1 = arith.constant 0 : i32
    return %c0_i32, %c0_i32_0 : i32, i32
  }
  func.func @transform_1(%arg0: i32) -> (i32, i32) {
    %c0_i32 = arith.constant 0 : i32
    %c0_i32_0 = arith.constant 0 : i32
    %c0_i32_1 = arith.constant 0 : i32
    return %c0_i32, %c0_i32_0 : i32, i32
  }
  func.func @transform_2(%arg0: i32) -> (i32, i32) {
    %c0_i32 = arith.constant 0 : i32
    %c0_i32_0 = arith.constant 0 : i32
    %c0_i32_1 = arith.constant 0 : i32
    return %c0_i32, %c0_i32_0 : i32, i32
  }
  func.func @transform_3(%arg0: i32) -> (i32, i32, i32) {
    %c0_i32 = arith.constant 0 : i32
    %c0_i32_0 = arith.constant 0 : i32
    %c0_i32_1 = arith.constant 0 : i32
    %c0_i32_2 = arith.constant 0 : i32
    return %c0_i32, %c0_i32_0, %c0_i32_1 : i32, i32, i32
  }
  func.func @transform_4(%arg0: i32) -> (i32, i32, i32) {
    %c0_i32 = arith.constant 0 : i32
    %c0_i32_0 = arith.constant 0 : i32
    %c0_i32_1 = arith.constant 0 : i32
    %c0_i32_2 = arith.constant 0 : i32
    return %c0_i32, %c0_i32_0, %c0_i32_1 : i32, i32, i32
  }
  func.func @transform_5(%arg0: i32) -> (i32, i32, i32) {
    %c0_i32 = arith.constant 0 : i32
    %c0_i32_0 = arith.constant 0 : i32
    %c0_i32_1 = arith.constant 0 : i32
    %c0_i32_2 = arith.constant 0 : i32
    return %c0_i32, %c0_i32_0, %c0_i32_1 : i32, i32, i32
  }
  func.func @transform_6(%arg0: i32) -> (i32, i32, i32) {
    %c0_i32 = arith.constant 0 : i32
    %c0_i32_0 = arith.constant 0 : i32
    %c0_i32_1 = arith.constant 0 : i32
    %c0_i32_2 = arith.constant 0 : i32
    return %c0_i32, %c0_i32_0, %c0_i32_1 : i32, i32, i32
  }
  func.func @transform_7(%arg0: i32) -> (i32, i32, i32) {
    %c0_i32 = arith.constant 0 : i32
    %c0_i32_0 = arith.constant 0 : i32
    %c0_i32_1 = arith.constant 0 : i32
    %c0_i32_2 = arith.constant 0 : i32
    return %c0_i32, %c0_i32_0, %c0_i32_1 : i32, i32, i32
  }
  func.func @transform_8(%arg0: i32) -> (i32, i32) {
    %c0_i32 = arith.constant 0 : i32
    %c0_i32_0 = arith.constant 0 : i32
    %c0_i32_1 = arith.constant 0 : i32
    return %c0_i32, %c0_i32_0 : i32, i32
  }
  func.func @transform_9(%arg0: i32) -> (i32, i32) {
    %c0_i32 = arith.constant 0 : i32
    %c0_i32_0 = arith.constant 0 : i32
    %c0_i32_1 = arith.constant 0 : i32
    return %c0_i32, %c0_i32_0 : i32, i32
  }
}

</mosaic_0001>

<bundles_post_ra>
// kernel: tpu_custom_call.1
= control target key start
LH: loop header
LB: loop body
LE: loop exit
PB: predicated region body
PF: predicated region fallthrough
CT: control target
= control target key end

     0   :  { %14 = vsyncpa [#allocation3], 0  ;;  %s2850_s0 = inlined_call_operand.hbm [shape: f32[16,16], index: 0, kind: input, shape index: {}]   ;;  %s2851_s1 = inlined_call_operand.hbm [shape: f32[16,16], index: 1, kind: input, shape index: {}]   ;;  %s2852_s2 = inlined_call_operand.hbm [shape: f32[17,32], index: 2, kind: input, shape index: {}]   ;;  %s2853_s3 = inlined_call_operand.vmem [shape: f32[2,32,96], index: 3, kind: input, shape index: {}]   ;;  %s2854_s4 = inlined_call_operand.vmem [shape: f32[2,32,32], index: 4, kind: input, shape index: {}]   ;;  %s2855_s5 = inlined_call_operand.vmem [shape: f32[2,32,64], index: 5, kind: input, shape index: {}]   ;;  %s2856_s6 = inlined_call_operand.vmem [shape: f32[2,64,32], index: 6, kind: input, shape index: {}]   ;;  %s2857_s7 = inlined_call_operand.hbm [shape: f32[2,8,128], index: 7, kind: input, shape index: {}]   ;;  %s2858_s8 = inlined_call_operand.hbm [shape: f32[33,128], index: 8, kind: input, shape index: {}]   ;;  %s2859_s9 = inlined_call_operand.hbm [shape: f32[16,128], index: 9, kind: output, shape index: {}]  }
   0x1   :  { %15 = vsyncpa [#allocation6], 0 }
   0x2   :  { %16 = vsyncpa [#allocation9], 0 }
   0x3   :  { %17 = vsyncpa [#allocation4], 0  ;;  %s35_s11 = sshll.u32 %s2851_s1, 4  ;;  %s2273_s12 = smov [#allocation5]   ;;  %s36_s11 = int_to_ptr.hbm [resolvable:$true] %s35_s11 }
   0x4   :  { %s37_s13 = sshll.u32 %s2273_s12, 4  ;;  %s69_s16 = sshll.u32 %s2857_s7, 4  ;;  %s38_s13 = int_to_ptr.vmem [resolvable:$true] %s37_s13  ;;  %s70_s16 = int_to_ptr.hbm [resolvable:$true] %s69_s16 }
   0x5   :  { %s2274_s17 = smov 128   ;;  %s2275_s18 = smov 8  }
   0x6   :  { %43 = dma.hbm_to_vmem [thread:$0]  %s36_s11, 256, %s38_s13, [#allocation6], %s2274_s17, %s2274_s17, %s2275_s18  }
   0x7   :  { %s2276_s19 = smov [#allocation8]   ;;  %s22_s1 = sshll.u32 %s2850_s0, 4  ;;  %s23_s1 = int_to_ptr.hbm [resolvable:$true] %s22_s1 }
   0x8   :  { %s71_s20 = sshll.u32 %s2276_s19, 4  ;;  %s48_s24 = sshll.u32 %s2852_s2, 4  ;;  %s72_s20 = int_to_ptr.vmem [resolvable:$true] %s71_s20  ;;  %s49_s24 = int_to_ptr.hbm [resolvable:$true] %s48_s24 }
   0x9   :  { %77 = dma.hbm_to_vmem [thread:$0]  %s70_s16, 256, %s72_s20, [#allocation9], %s2274_s17, %s2274_s17, %s2275_s18  }
   0xa   :  { %s2277_s25 = smov [#allocation2]   ;;  %s2278_s27 = smov [#allocation7]  }
   0xb   :  { %s24_s26 = sshll.u32 %s2277_s25, 4  ;;  %s50_s0 = sshll.u32 %s2278_s27, 4  ;;  %s25_s26 = int_to_ptr.vmem [resolvable:$true] %s24_s26  ;;  %s51_s0 = int_to_ptr.vmem [resolvable:$true] %s50_s0 }
   0xc   :  { %30 = dma.hbm_to_vmem [thread:$0]  %s23_s1, 256, %s25_s26, [#allocation3], %s2274_s17, %s2274_s17, %s2275_s18  }
   0xd   :  { %s82_s30 = sshll.u32 %s2858_s8, 4  ;;  %s2279_s2 = smov [#allocation10]   ;;  %s83_s30 = int_to_ptr.hbm [resolvable:$true] %s82_s30 }
   0xe   :  { %56 = dma.hbm_to_vmem [thread:$0]  %s49_s24, 384, %s51_s0, [#allocation6], %s2274_s17, %s2274_s17, %s2275_s18  }
   0xf   :  { %s84_s10 = sshll.u32 %s2279_s2, 4  ;;  %s85_s10 = int_to_ptr.vmem [resolvable:$true] %s84_s10 }
  0x10   :  { %90 = dma.hbm_to_vmem [thread:$0]  %s83_s30, 640, %s85_s10, [#allocation9], %s2274_s17, %s2274_s17, %s2275_s18  }
  0x11   :  { %2265 = dma.done.wait [#allocation3], 256  }
  0x12   :  { %2266 = vsyncadd [#allocation3], 4294967040 }
  0x13   :  { %2267 = dma.done.wait [#allocation6], 640  }
  0x14   :  { %2268 = vsyncadd [#allocation6], 4294966656 }
  0x15   :  { %2269 = dma.done.wait [#allocation9], 896  }
  0x16   :  { %2270 = vsyncadd [#allocation9], 4294966400  ;;  %v114_v0 = vld [vmem:[#allocation7 + $0x8] sm:$0xff]  ;;  %v113_v1 = vld [vmem:[#allocation7] sm:$0xff]  ;;  %vm119_vm0 = vcmask 130048   ;;  %vm155_vm1 = vcmask 261120  }
  0x17   :  { %140 = vmatpush.msra.mxu0 %v114_v0  ;;  %v116_v2 = vld [vmem:[#allocation2] sm:$0xff]  ;;  %v153_v3 = vld [vmem:[%s2853_s3 + $0x18] sm:$0xff]  ;;  %v152_v4 = vld [vmem:[%s2853_s3 + $0x10] sm:$0xff]  ;;  %s2280_s20 = smov 96   ;;  %s2281_s21 = smov 64   ;;  %vm195_vm2 = vcmask 64512  }
  0x18   :  { %174 = vmatpush.msra.mxu1 %v153_v3  ;;  %v117_v5 = vld [vmem:[#allocation2 + $0x8] sm:$0xff]  ;;  %v150_v7 = vld [vmem:[%s2853_s3] sm:$0xff]  ;;  %v2034_v8 = vld [vmem:[#allocation7 + $0x10] ss:$0 sm:$0xff]  ;;  %s2282_s22 = smov 120   ;;  %s2283_s1 = smov 72  }
  0x19   :  { %141 = vmatpush.msra.mxu0 %v113_v1  ;;  %v151_v6 = vld [vmem:[%s2853_s3 + $0x8] sm:$0xff]  ;;  %v2395_v14 = vld [vmem:[#allocation8] sm:$0xff]  ;;  %s2284_s7 = smov 104   ;;  %v185_v21 = vld [vmem:[%s2854_s4] sm:$0xff]  ;;  %s2285_s25 = smov 88  }
  0x1a   :  { %1874 = vmatmul.msk.f32.vlgmr.msra.gmra.mxu0 %vm119_vm0, %v116_v2  ;;  %175 = vmatpush.msra.mxu1 %v152_v4  ;;  %v154_v15 = vperm.slane %v2395_v14, 0  ;;  %v2434_v28 = vld [vmem:[#allocation5] sm:$0xff]  ;;  %v2438_v32 = vld [vmem:[#allocation5 + $0x8] sm:$0xff]  ;;  %s2286_s26 = smov 112   ;;  %s2287_s27 = smov 80  }
  0x1b   :  { %s2288_s0 = smov 56   ;;  %s2289_s28 = smov 48  }
  0x1c   :  { %176 = vmatpush.msra.mxu1 %v151_v6  ;;  %s2290_s29 = smov 40  }
  0x1e   :  { %177 = vmatpush.msra.mxu1 %v150_v7 }
  0x22   :  { %1875 = vmatmul.msk.f32.gmra.mxu0 %vm119_vm0, %v117_v5 }
  0x97   :  { %v143_v9 = vpop.f32.mrf.mxu0 }
  0x98   :  { %v2387_v10 = vadd.f32 %v2034_v8, %v143_v9 }
  0x9a   :  { %1876 = vmatmul.msk.f32.vlgmr.msra.gmra.mxu1 %vm155_vm1, %v2387_v10 }
  0x9f   :  { %v146_v11 = vpop.f32.mrf.mxu0 }
  0xa0   :  { %v2391_v12 = vadd.f32 %v2034_v8, %v146_v11 }
  0xa2   :  { %1877 = vmatmul.msk.f32.gmra.mxu1 %vm155_vm1, %v2391_v12 }
 0x117   :  { %v179_v13 = vpop.f32.mrf.mxu1 }
 0x118   :  { %v2402_v18 = vadd.f32 %v179_v13, %v154_v15 }
 0x11f   :  { %v182_v16 = vpop.f32.mrf.mxu1 }
 0x120   :  { %v2398_v17 = vadd.f32 %v182_v16, %v154_v15 }
 0x122   :  { %193 = vrot.lane.b32.xlu0 %v2398_v17, %s2280_s20  ;;  %v2408_v19 = vpack.i.bf16 %v2402_v18, %v2398_v17 }
 0x12a   :  { %191 = vrot.lane.b32.xlu0 %v2402_v18, %s2280_s20 }
 0x132   :  { %1995 = vrot.lane.b32.xlu0 %v2408_v19, %s2281_s21 }
 0x13a   :  { %310 = vrot.lane.b32.xlu0 %v2402_v18, %s2282_s22 }
 0x142   :  { %649 = vrot.lane.b32.xlu0 %v2398_v17, %s2283_s1 }
 0x14a   :  { %312 = vrot.lane.b32.xlu0 %v2398_v17, %s2282_s22 }
 0x152   :  { %643 = vrot.lane.b32.xlu0 %v2402_v18, %s2284_s7 }
 0x15a   :  { %645 = vrot.lane.b32.xlu0 %v2398_v17, %s2284_s7 }
 0x194   :  { %v194_v20 = vpop.permute.xlu0 %193 }
 0x195   :  { %1878 = vmatpush.xpose.msk.msra.mxu2 %vm195_vm2, %v194_v20 }
 0x19c   :  { %v192_v22 = vpop.permute.xlu0 %191 }
 0x19d   :  { %1879 = vmatpush.xpose.msk.msra.mxu2 %vm195_vm2, %v192_v22 }
 0x1a0   :  { %1880 = vmatmul.msk.f32.vlgmr.msra.gmra.mxu2 %vm195_vm2, %v2402_v18 }
 0x1a1   :  { %482 = vmatpush.msrb.mxu2 %v185_v21 }
 0x1a4   :  { %v1996_v23 = vpop.permute.xlu0 %1995 }
 0x1a5   :  { %v1997_v24 = vunpack.i.l.bf16 %v1996_v23  ;;  %v1998_v25 = vunpack.i.h.bf16 %v1996_v23 }
 0x1a7   :  { %301 = vmatpush.msra.mxu3 %v1997_v24 }
 0x1a8   :  { %1881 = vmatmul.msk.f32.gmra.mxu2 %vm195_vm2, %v2398_v17 }
 0x1a9   :  { %302 = vmatpush.msra.mxu3 %v1998_v25 }
 0x1ac   :  { %v2431_v26 = vpop.permute.xlu0 %310 }
 0x1b4   :  { %v650_v27 = vpop.permute.xlu0 %649 }
 0x1b5   :  { %1902 = vmatpush.xpose.msk.msra.mxu2 %vm195_vm2, %v650_v27 }
 0x1bc   :  { %v313_v11 = vpop.permute.xlu0 %312 }
 0x223   :  { %v221_v29 = vpop.f32.mrf.mxu2 }
 0x224   :  { %v222_v30 = vadd.f32 %v221_v29, %v2434_v28 }
 0x226   :  { %v227_v31 = vsel %vm119_vm0, %v222_v30, -inf }
 0x227   :  { %228 = vmax.xlane.f32.xlu1 %v227_v31 }
 0x22b   :  { %v224_v33 = vpop.f32.mrf.mxu2 }
 0x22c   :  { %v225_v34 = vadd.f32 %v224_v33, %v2438_v32 }
 0x22e   :  { %v230_v35 = vsel %vm119_vm0, %v225_v34, -inf }
 0x22f   :  { %231 = vmax.xlane.f32.xlu1 %v230_v35 }
 0x248   :  { %316 = vrot.lane.b32.xlu1 %v2398_v17, %s2285_s25 }
 0x250   :  { %647 = vrot.lane.b32.xlu1 %v2402_v18, %s2283_s1 }
 0x258   :  { %490 = vrot.lane.b32.xlu1 %v2402_v18, %s2286_s26 }
 0x29a   :  { %v229_v36 = vpop.xlane.xlu1 %228 }
 0x29b   :  { %v233_v37 = vsub.f32 %v222_v30, %v229_v36  ;;  %v644_v30 = vpop.permute.xlu0 %643 }
 0x29d   :  { %v235_v38 = vmul.f32 1.442695, %v233_v37 }
 0x29f   :  { %2036 = vpow2.f32 %v235_v38 }
 0x2a2   :  { %v232_v39 = vpop.xlane.xlu1 %231 }
 0x2a3   :  { %v234_v40 = vsub.f32 %v225_v34, %v232_v39  ;;  %v646_v35 = vpop.permute.xlu0 %645 }
 0x2a5   :  { %v2037_v41 = vpop.eup %2036  ;;  %v237_v42 = vmul.f32 1.442695, %v234_v40 }
 0x2a6   :  { %v239_v43 = vsel %vm119_vm0, %v2037_v41, 0.0 }
 0x2a7   :  { %2038 = vpow2.f32 %v237_v42  ;;  %240 = vadd.xlane.f32.xlu2 %v239_v43 }
 0x2ad   :  { %v2039_v44 = vpop.eup %2038 }
 0x2ae   :  { %v242_v45 = vsel %vm119_vm0, %v2039_v44, 0.0 }
 0x2af   :  { %243 = vadd.xlane.f32.xlu2 %v242_v45 }
 0x2ba   :  { %v317_v46 = vpop.permute.xlu1 %316 }
 0x2bb   :  { %1884 = vmatpush.xpose.msk.msrb.mxu0 %vm195_vm2, %v317_v46 }
 0x2c2   :  { %v648_v47 = vpop.permute.xlu1 %647 }
 0x2c3   :  { %1903 = vmatpush.xpose.msk.msra.mxu2 %vm195_vm2, %v648_v47 }
 0x2c7   :  { %314 = vrot.lane.b32.xlu2 %v2402_v18, %s2285_s25 }
 0x2ca   :  { %v491_v15 = vpop.permute.xlu1 %490 }
 0x2cf   :  { %496 = vrot.lane.b32.xlu2 %v2398_v17, %s2287_s27 }
 0x2d7   :  { %494 = vrot.lane.b32.xlu2 %v2402_v18, %s2287_s27 }
 0x2df   :  { %492 = vrot.lane.b32.xlu2 %v2398_v17, %s2286_s26 }
 0x31a   :  { %v241_v48 = vpop.xlane.xlu2 %240 }
 0x31b   :  { %2040 = vrcp.f32 %v241_v48  ;;  %v256_v53 = vand.u32 2147483648, %v241_v48  ;;  %v254_v55 = vand.u32 2147483647, %v241_v48  ;;  %vm250_vm4 = vweird.f32 %v241_v48 }
 0x31d   :  { %v257_v58 = vor.u32 1.1754944e-38, %v256_v53  ;;  %vm255_vm6 = vcmp.eq.f32.partialorder %v254_v55, 8.507059e+37 }
 0x321   :  { %v2041_v49 = vpop.eup %2040 }
 0x322   :  { %v246_v50 = vmul.f32 %v2041_v49, %v241_v48  ;;  %v244_v51 = vpop.xlane.xlu2 %243  ;;  %vm251_vm3 = vweird.f32 %v2041_v49 }
 0x323   :  { %2042 = vrcp.f32 %v244_v51  ;;  %vm252_vm5 = vmor %vm250_vm4, %vm251_vm3  ;;  %v270_v1 = vand.u32 2147483648, %v244_v51  ;;  %v268_v3 = vand.u32 2147483647, %v244_v51  ;;  %vm264_vm8 = vweird.f32 %v244_v51 }
 0x324   :  { %v247_v52 = vsub.f32 1.0, %v246_v50 }
 0x325   :  { %v271_v5 = vor.u32 1.1754944e-38, %v270_v1  ;;  %vm269_vm10 = vcmp.eq.f32.partialorder %v268_v3, 8.507059e+37 }
 0x326   :  { %v248_v54 = vmul.f32 %v2041_v49, %v247_v52 }
 0x328   :  { %v249_v56 = vadd.f32 %v2041_v49, %v248_v54 }
 0x329   :  { %v2043_v57 = vpop.eup %2042 }
 0x32a   :  { %v260_v59 = vmul.f32 %v2043_v57, %v244_v51  ;;  %v315_v60 = vpop.permute.xlu2 %314  ;;  %v253_v61 = vsel %vm252_vm5, %v2041_v49, %v249_v56  ;;  %vm265_vm7 = vweird.f32 %v2043_v57 }
 0x32b   :  { %1885 = vmatpush.xpose.msk.msrb.mxu0 %vm195_vm2, %v315_v60  ;;  %v258_v62 = vsel %vm255_vm6, %v257_v58, %v253_v61  ;;  %vm266_vm9 = vmor %vm264_vm8, %vm265_vm7 }
 0x32c   :  { %v261_v63 = vsub.f32 1.0, %v260_v59  ;;  %v273_v0 = vmul.f32 %v2037_v41, %v258_v62 }
 0x32e   :  { %v262_v2 = vmul.f32 %v2043_v57, %v261_v63  ;;  %1882 = vmatmul.msk.f32.vlgmr.msra.gmra.mxu3 %vm119_vm0, %v273_v0  ;;  %1886 = vmatmul.msk.f32.vlgmr.msrb.gmra.mxu0 %vm195_vm2, %v2431_v26 }
 0x330   :  { %v263_v4 = vadd.f32 %v2043_v57, %v262_v2 }
 0x332   :  { %v497_v6 = vpop.permute.xlu2 %496  ;;  %v267_v7 = vsel %vm266_vm9, %v2043_v57, %v263_v4 }
 0x333   :  { %1894 = vmatpush.xpose.msk.msra.mxu0 %vm195_vm2, %v497_v6  ;;  %v272_v8 = vsel %vm269_vm10, %v271_v5, %v267_v7 }
 0x334   :  { %v274_v9 = vmul.f32 %v2039_v44, %v272_v8 }
 0x336   :  { %1883 = vmatmul.msk.f32.gmra.mxu3 %vm119_vm0, %v274_v9  ;;  %1887 = vmatmul.msk.f32.gmra.mxu0 %vm195_vm2, %v313_v11 }
 0x33a   :  { %v495_v13 = vpop.permute.xlu2 %494 }
 0x33b   :  { %1895 = vmatpush.xpose.msk.msra.mxu0 %vm195_vm2, %v495_v13 }
 0x33e   :  { %1896 = vmatmul.msk.f32.vlgmr.msra.gmra.mxu0 %vm195_vm2, %v491_v15 }
 0x342   :  { %v493_v16 = vpop.permute.xlu2 %492 }
 0x346   :  { %1897 = vmatmul.msk.f32.gmra.mxu0 %vm195_vm2, %v493_v16 }
 0x3ab   :  { %v343_v17 = vpop.f32.mrf.mxu0 }
 0x3ac   :  { %v344_v18 = vadd.f32 %v343_v17, %v2434_v28 }
 0x3ae   :  { %v349_v20 = vsel %vm119_vm0, %v344_v18, -inf }
 0x3af   :  { %350 = vmax.xlane.f32.xlu1 %v349_v20 }
 0x3b1   :  { %v304_v21 = vpop.f32.mrf.mxu3 }
 0x3b2   :  { %1892 = vmatmul.msk.f32.vlgmr.msrb.gmra.mxu2 %vm195_vm2, %v304_v21 }
 0x3b3   :  { %v346_v22 = vpop.f32.mrf.mxu0 }
 0x3b4   :  { %v347_v23 = vadd.f32 %v346_v22, %v2438_v32 }
 0x3b6   :  { %v352_v24 = vsel %vm119_vm0, %v347_v23, -inf }
 0x3b7   :  { %353 = vmax.xlane.f32.xlu0 %v352_v24 }
 0x3b9   :  { %v307_v25 = vpop.f32.mrf.mxu3 }
 0x3ba   :  { %1893 = vmatmul.msk.f32.gmra.mxu2 %vm195_vm2, %v307_v25 }
 0x3bb   :  { %v523_v26 = vpop.f32.mrf.mxu0 }
 0x3bc   :  { %v524_v27 = vadd.f32 %v523_v26, %v2434_v28 }
 0x3be   :  { %v529_v29 = vsel %vm119_vm0, %v524_v27, -inf }
 0x3bf   :  { %530 = vmax.xlane.f32.xlu2 %v529_v29 }
 0x3c2   :  { %1904 = vmatmul.msk.f32.vlgmr.msra.gmra.mxu2 %vm195_vm2, %v644_v30 }
 0x3c3   :  { %v526_v31 = vpop.f32.mrf.mxu0 }
 0x3c4   :  { %v527_v33 = vadd.f32 %v526_v31, %v2438_v32 }
 0x3c6   :  { %v532_v34 = vsel %vm119_vm0, %v527_v33, -inf }
 0x3c7   :  { %533 = vmax.xlane.f32.xlu2 %v532_v34 }
 0x3ca   :  { %1905 = vmatmul.msk.f32.gmra.mxu2 %vm195_vm2, %v646_v35 }
 0x422   :  { %v351_v42 = vpop.xlane.xlu1 %350 }
 0x423   :  { %v355_v44 = vsub.f32 %v344_v18, %v351_v42 }
 0x425   :  { %v357_v46 = vmul.f32 1.442695, %v355_v44 }
 0x42a   :  { %v354_v36 = vpop.xlane.xlu0 %353 }
 0x42b   :  { %v356_v37 = vsub.f32 %v347_v23, %v354_v36 }
 0x42d   :  { %v359_v38 = vmul.f32 1.442695, %v356_v37 }
 0x42f   :  { %2044 = vpow2.f32 %v359_v38 }
 0x430   :  { %2046 = vpow2.f32 %v357_v46 }
 0x432   :  { %v531_v45 = vpop.xlane.xlu2 %530 }
 0x433   :  { %v535_v49 = vsub.f32 %v524_v27, %v531_v45 }
 0x435   :  { %v2482_v39 = vpop.eup %2044  ;;  %v2484_v40 = vpop.f32.mrf.mxu2  ;;  %v537_v51 = vmul.f32 1.442695, %v535_v49 }
 0x436   :  { %v364_v41 = vsel %vm119_vm0, %v2482_v39, 0.0  ;;  %v2492_v53 = vpop.eup %2046 }
 0x437   :  { %365 = vadd.xlane.f32.xlu2 %v364_v41  ;;  %2048 = vpow2.f32 %v537_v51  ;;  %v361_v58 = vsel %vm119_vm0, %v2492_v53, 0.0 }
 0x43a   :  { %v534_v52 = vpop.xlane.xlu2 %533 }
 0x43b   :  { %v536_v56 = vsub.f32 %v527_v33, %v534_v52 }
 0x43d   :  { %v2488_v43 = vpop.f32.mrf.mxu2  ;;  %v2498_v59 = vpop.eup %2048 }
 0x43e   :  { %v541_v60 = vsel %vm119_vm0, %v2498_v59, 0.0 }
 0x445   :  { %v676_v47 = vpop.f32.mrf.mxu2 }
 0x446   :  { %v677_v48 = vadd.f32 %v676_v47, %v2434_v28  ;;  %v539_v28 = vmul.f32 1.442695, %v536_v56 }
 0x448   :  { %v682_v50 = vsel %vm119_vm0, %v677_v48, -inf  ;;  %2050 = vpow2.f32 %v539_v28 }
 0x449   :  { %683 = vmax.xlane.f32.xlu1 %v682_v50 }
 0x44d   :  { %v679_v54 = vpop.f32.mrf.mxu2 }
 0x44e   :  { %v680_v55 = vadd.f32 %v679_v54, %v2438_v32  ;;  %v2502_v61 = vpop.eup %2050 }
 0x44f   :  { %v544_v32 = vsel %vm119_vm0, %v2502_v61, 0.0 }
 0x450   :  { %v685_v57 = vsel %vm119_vm0, %v680_v55, -inf }
 0x451   :  { %686 = vmax.xlane.f32.xlu0 %v685_v57  ;;  %362 = vadd.xlane.f32.xlu1 %v361_v58 }
 0x459   :  { %542 = vadd.xlane.f32.xlu0 %v541_v60 }
 0x461   :  { %545 = vadd.xlane.f32.xlu0 %v544_v32 }
 0x46a   :  { %2000 = vrot.lane.b32.xlu1 %v2408_v19, %s2288_s0 }
 0x475   :  { %2005 = vrot.lane.b32.xlu0 %v2408_v19, %s2289_s28 }
 0x4aa   :  { %v366_v3 = vpop.xlane.xlu2 %365 }
 0x4ab   :  { %v392_v41 = vand.u32 2147483648, %v366_v3  ;;  %vm386_vm3 = vweird.f32 %v366_v3  ;;  %v390_v45 = vand.u32 2147483647, %v366_v3 }
 0x4ad   :  { %v393_v49 = vor.u32 1.1754944e-38, %v392_v41  ;;  %vm391_vm5 = vcmp.eq.f32.partialorder %v390_v45, 8.507059e+37 }
 0x4bc   :  { %v684_v62 = vpop.xlane.xlu1 %683 }
 0x4bd   :  { %v688_v63 = vsub.f32 %v677_v48, %v684_v62 }
 0x4bf   :  { %v690_v0 = vmul.f32 1.442695, %v688_v63 }
 0x4c1   :  { %2052 = vpow2.f32 %v690_v0 }
 0x4c4   :  { %v687_v1 = vpop.xlane.xlu0 %686  ;;  %v363_v2 = vpop.xlane.xlu1 %362 }
 0x4c5   :  { %v689_v4 = vsub.f32 %v680_v55, %v687_v1  ;;  %2054 = vrcp.f32 %v363_v2  ;;  %v378_v25 = vand.u32 2147483648, %v363_v2  ;;  %vm372_vm12 = vweird.f32 %v363_v2 }
 0x4c6   :  { %2056 = vrcp.f32 %v366_v3  ;;  %v376_v26 = vand.u32 2147483647, %v363_v2 }
 0x4c7   :  { %v2510_v5 = vpop.eup %2052  ;;  %v692_v6 = vmul.f32 1.442695, %v689_v4  ;;  %v379_v31 = vor.u32 1.1754944e-38, %v378_v25 }
 0x4c8   :  { %v694_v7 = vsel %vm119_vm0, %v2510_v5, 0.0  ;;  %vm377_vm14 = vcmp.eq.f32.partialorder %v376_v26, 8.507059e+37 }
 0x4c9   :  { %2058 = vpow2.f32 %v692_v6  ;;  %695 = vadd.xlane.f32.xlu2 %v694_v7 }
 0x4cb   :  { %v2055_v8 = vpop.eup %2054 }
 0x4cc   :  { %v368_v9 = vmul.f32 %v2055_v8, %v363_v2  ;;  %v2514_v11 = vpop.xlane.xlu0 %542  ;;  %v2057_v13 = vpop.eup %2056  ;;  %vm373_vm11 = vweird.f32 %v2055_v8 }
 0x4cd   :  { %2060 = vrcp.f32 %v2514_v11  ;;  %v382_v18 = vmul.f32 %v2057_v13, %v366_v3  ;;  %vm374_vm13 = vmor %vm372_vm12, %vm373_vm11  ;;  %vm387_vm15 = vweird.f32 %v2057_v13  ;;  %v558_v54 = vand.u32 2147483648, %v2514_v11 }
 0x4ce   :  { %v369_v15 = vsub.f32 1.0, %v368_v9  ;;  %vm388_vm4 = vmor %vm386_vm3, %vm387_vm15  ;;  %vm552_vm7 = vweird.f32 %v2514_v11 }
 0x4cf   :  { %v2516_v16 = vpop.eup %2058  ;;  %v383_v21 = vsub.f32 1.0, %v382_v18  ;;  %v559_v60 = vor.u32 1.1754944e-38, %v558_v54  ;;  %v796_v54 = vperm.slane %v2395_v14, 1 }
 0x4d0   :  { %v697_v17 = vsel %vm119_vm0, %v2516_v16, 0.0  ;;  %v370_v20 = vmul.f32 %v2055_v8, %v369_v15 }
 0x4d1   :  { %698 = vadd.xlane.f32.xlu2 %v697_v17  ;;  %v384_v27 = vmul.f32 %v2057_v13, %v383_v21 }
 0x4d2   :  { %v371_v22 = vadd.f32 %v2055_v8, %v370_v20 }
 0x4d3   :  { %v2061_v24 = vpop.eup %2060  ;;  %v385_v37 = vadd.f32 %v2057_v13, %v384_v27 }
 0x4d4   :  { %v2521_v23 = vpop.xlane.xlu0 %545  ;;  %v548_v29 = vmul.f32 %v2061_v24, %v2514_v11  ;;  %v375_v30 = vsel %vm374_vm13, %v2055_v8, %v371_v22  ;;  %vm553_vm6 = vweird.f32 %v2061_v24 }
 0x4d5   :  { %2062 = vrcp.f32 %v2521_v23  ;;  %v380_v35 = vsel %vm377_vm14, %v379_v31, %v375_v30  ;;  %v389_v48 = vsel %vm388_vm4, %v2057_v13, %v385_v37  ;;  %vm554_vm8 = vmor %vm552_vm7, %vm553_vm6  ;;  %v572_v0 = vand.u32 2147483648, %v2521_v23 }
 0x4d6   :  { %v549_v36 = vsub.f32 1.0, %v548_v29  ;;  %v395_v44 = vmul.f32 %v2492_v53, %v380_v35  ;;  %v394_v50 = vsel %vm391_vm5, %v393_v49, %v389_v48  ;;  %v556_v53 = vand.u32 2147483647, %v2514_v11 }
 0x4d7   :  { %v396_v57 = vmul.f32 %v2482_v39, %v394_v50  ;;  %vm566_vm11 = vweird.f32 %v2521_v23  ;;  %v573_v2 = vor.u32 1.1754944e-38, %v572_v0 }
 0x4d8   :  { %v550_v46 = vmul.f32 %v2061_v24, %v549_v36  ;;  %vm557_vm9 = vcmp.eq.f32.partialorder %v556_v53, 8.507059e+37 }
 0x4da   :  { %v551_v51 = vadd.f32 %v2061_v24, %v550_v46 }
 0x4db   :  { %v2063_v38 = vpop.eup %2062 }
 0x4dc   :  { %v2001_v33 = vpop.permute.xlu1 %2000  ;;  %v562_v47 = vmul.f32 %v2063_v38, %v2521_v23  ;;  %v555_v58 = vsel %vm554_vm8, %v2061_v24, %v551_v51  ;;  %vm567_vm10 = vweird.f32 %v2063_v38 }
 0x4dd   :  { %v2002_v34 = vunpack.i.l.bf16 %v2001_v33  ;;  %v2003_v42 = vunpack.i.h.bf16 %v2001_v33  ;;  %v560_v62 = vsel %vm557_vm9, %v559_v60, %v555_v58  ;;  %vm568_vm12 = vmor %vm566_vm11, %vm567_vm10 }
 0x4de   :  { %v563_v52 = vsub.f32 1.0, %v562_v47  ;;  %v575_v39 = vmul.f32 %v2498_v59, %v560_v62  ;;  %v186_v59 = vld [vmem:[%s2854_s4 + $0x8] sm:$0xff] }
 0x4df   :  { %423 = vmatpush.msrb.mxu3 %v2002_v34  ;;  %453 = vmatpush.msrb.mxu1 %v186_v59 }
 0x4e0   :  { %v564_v28 = vmul.f32 %v2063_v38, %v563_v52 }
 0x4e1   :  { %424 = vmatpush.msrb.mxu3 %v2003_v42 }
 0x4e2   :  { %1888 = vmatmul.msk.f32.vlgmr.msrb.gmra.mxu3 %vm119_vm0, %v395_v44  ;;  %v565_v63 = vadd.f32 %v2063_v38, %v564_v28 }
 0x4e4   :  { %v569_v1 = vsel %vm568_vm12, %v2063_v38, %v565_v63  ;;  %v187_v38 = vld [vmem:[%s2854_s4 + $0x10] sm:$0xff] }
 0x4e5   :  { %633 = vmatpush.msra.mxu1 %v187_v38 }
 0x4e7   :  { %v2006_v55 = vpop.permute.xlu0 %2005 }
 0x4e8   :  { %v2007_v56 = vunpack.i.l.bf16 %v2006_v55  ;;  %v2008_v32 = vunpack.i.h.bf16 %v2006_v55 }
 0x4e9   :  { %2010 = vrot.lane.b32.xlu2 %v2408_v19, %s2290_s29  ;;  %v570_v19 = vand.u32 2147483647, %v2521_v23 }
 0x4ea   :  { %1889 = vmatmul.msk.f32.gmra.mxu3 %vm119_vm0, %v396_v57 }
 0x4eb   :  { %603 = vmatpush.msra.mxu3 %v2007_v56  ;;  %vm571_vm13 = vcmp.eq.f32.partialorder %v570_v19, 8.507059e+37  ;;  %v2291_v19 = vmov 32.0  }
 0x4ec   :  { %v574_v3 = vsel %vm571_vm13, %v573_v2, %v569_v1 }
 0x4ed   :  { %604 = vmatpush.msra.mxu3 %v2008_v32  ;;  %v576_v4 = vmul.f32 %v2502_v61, %v574_v3 }
 0x4f2   :  { %1898 = vmatmul.msk.f32.vlgmr.msra.gmra.mxu3 %vm119_vm0, %v575_v39 }
 0x4fa   :  { %1899 = vmatmul.msk.f32.gmra.mxu3 %vm119_vm0, %v576_v4 }
 0x53c   :  { %v696_v6 = vpop.xlane.xlu2 %695 }
 0x53d   :  { %2064 = vrcp.f32 %v696_v6  ;;  %v711_v13 = vand.u32 2147483648, %v696_v6  ;;  %v709_v17 = vand.u32 2147483647, %v696_v6  ;;  %vm705_vm15 = vweird.f32 %v696_v6 }
 0x53f   :  { %v712_v20 = vor.u32 1.1754944e-38, %v711_v13  ;;  %vm710_vm4 = vcmp.eq.f32.partialorder %v709_v17, 8.507059e+37 }
 0x543   :  { %v2065_v7 = vpop.eup %2064 }
 0x544   :  { %v701_v8 = vmul.f32 %v2065_v7, %v696_v6  ;;  %v699_v9 = vpop.xlane.xlu2 %698  ;;  %vm706_vm14 = vweird.f32 %v2065_v7 }
 0x545   :  { %2066 = vrcp.f32 %v699_v9  ;;  %vm707_vm3 = vmor %vm705_vm15, %vm706_vm14  ;;  %v725_v27 = vand.u32 2147483648, %v699_v9  ;;  %v723_v33 = vand.u32 2147483647, %v699_v9  ;;  %vm719_vm6 = vweird.f32 %v699_v9 }
 0x546   :  { %v702_v11 = vsub.f32 1.0, %v701_v8  ;;  %2068 = vrcp.f32 %v2291_v19 }
 0x547   :  { %v726_v35 = vor.u32 1.1754944e-38, %v725_v27  ;;  %vm724_vm8 = vcmp.eq.f32.partialorder %v723_v33, 8.507059e+37  ;;  %v899_v27 = vld [vmem:[%s2856_s6 + $0x28] sm:$0xff] }
 0x548   :  { %v703_v15 = vmul.f32 %v2065_v7, %v702_v11 }
 0x54a   :  { %v704_v18 = vadd.f32 %v2065_v7, %v703_v15 }
 0x54b   :  { %v2067_v61 = vpop.eup %2066 }
 0x54c   :  { %v708_v21 = vsel %vm707_vm3, %v2065_v7, %v704_v18  ;;  %v715_v22 = vmul.f32 %v2067_v61, %v699_v9  ;;  %v2011_v23 = vpop.permute.xlu2 %2010  ;;  %vm720_vm5 = vweird.f32 %v2067_v61  ;;  %v2069_v1 = vpop.eup %2068  ;;  %v861_v18 = vld [vmem:[%s2855_s5 + $0x18] sm:$0xff]  ;;  %vm903_vm3 = vcmask 523264  }
 0x54d   :  { %v713_v24 = vsel %vm710_vm4, %v712_v20, %v708_v21  ;;  %v2012_v25 = vunpack.i.l.bf16 %v2011_v23  ;;  %v2013_v29 = vunpack.i.h.bf16 %v2011_v23  ;;  %vm721_vm7 = vmor %vm719_vm6, %vm720_vm5  ;;  %v808_v2 = vmul.f32 32.0, %v2069_v1  ;;  %v859_v20 = vld [vmem:[%s2855_s5 + $0x8] sm:$0xff]  ;;  %v858_v21 = vld [vmem:[%s2855_s5] sm:$0xff] }
 0x54e   :  { %v716_v26 = vsub.f32 1.0, %v715_v22  ;;  %v728_v31 = vmul.f32 %v2510_v5, %v713_v24  ;;  %v188_v5 = vld [vmem:[%s2854_s4 + $0x18] sm:$0xff]  ;;  %vm812_vm9 = vweird.f32 %v2069_v1 }
 0x54f   :  { %756 = vmatpush.msrb.mxu0 %v2012_v25  ;;  %786 = vmatpush.msrb.mxu3 %v188_v5  ;;  %v809_v3 = vsub.f32 1.0, %v808_v2  ;;  %v901_v25 = vld [vmem:[%s2856_s6 + $0x38] sm:$0xff] }
 0x550   :  { %v717_v30 = vmul.f32 %v2067_v61, %v716_v26  ;;  %v900_v26 = vld [vmem:[%s2856_s6 + $0x30] sm:$0xff]  ;;  %918 = vmatpush.msrb.mxu2 %v901_v25 }
 0x551   :  { %757 = vmatpush.msrb.mxu0 %v2013_v29 }
 0x552   :  { %1906 = vmatmul.msk.f32.vlgmr.msrb.gmra.mxu0 %vm119_vm0, %v728_v31  ;;  %v718_v34 = vadd.f32 %v2067_v61, %v717_v30  ;;  %919 = vmatpush.msrb.mxu2 %v900_v26  ;;  %v898_v31 = vld [vmem:[%s2856_s6 + $0x20] sm:$0xff] }
 0x554   :  { %v722_v36 = vsel %vm721_vm7, %v2067_v61, %v718_v34  ;;  %v860_v61 = vld [vmem:[%s2855_s5 + $0x10] sm:$0xff]  ;;  %920 = vmatpush.msrb.mxu2 %v899_v27 }
 0x555   :  { %v727_v37 = vsel %vm724_vm8, %v726_v35, %v722_v36  ;;  %v897_v35 = vld [vmem:[%s2856_s6 + $0x18] sm:$0xff] }
 0x556   :  { %v729_v41 = vmul.f32 %v2516_v16, %v727_v37  ;;  %921 = vmatpush.msrb.mxu2 %v898_v31 }
 0x558   :  { %922 = vmatpush.msrb.mxu2 %v897_v35 }
 0x55a   :  { %1907 = vmatmul.msk.f32.gmra.mxu0 %vm119_vm0, %v729_v41 }
 0x565   :  { %v426_v42 = vpop.f32.mrf.mxu3 }
 0x566   :  { %1890 = vmatmul.msk.f32.vlgmr.msrb.gmra.mxu1 %vm195_vm2, %v426_v42 }
 0x567   :  { %881 = vmatpush.msrb.mxu1 %v861_v18 }
 0x569   :  { %882 = vmatpush.msrb.mxu1 %v860_v61 }
 0x56b   :  { %883 = vmatpush.msrb.mxu1 %v859_v20 }
 0x56d   :  { %v429_v44 = vpop.f32.mrf.mxu3  ;;  %884 = vmatpush.msrb.mxu1 %v858_v21  ;;  %v1917_v21 = vld [vmem:[%s2853_s3 + $0x38] sm:$0xff] }
 0x56e   :  { %1891 = vmatmul.msk.f32.gmra.mxu1 %vm195_vm2, %v429_v44  ;;  %1011 = vmatpush.msra.mxu0 %v1917_v21  ;;  %v1920_v21 = vld [vmem:[%s2854_s4 + $0x20] sm:$0xff] }
 0x575   :  { %v606_v45 = vpop.f32.mrf.mxu3 }
 0x576   :  { %1900 = vmatmul.msk.f32.vlgmr.msra.gmra.mxu1 %vm195_vm2, %v606_v45  ;;  %v852_v45 = vperm.slane %v2395_v14, 4 }
 0x57d   :  { %v609_v46 = vpop.f32.mrf.mxu3 }
 0x57e   :  { %1901 = vmatmul.msk.f32.gmra.mxu1 %vm195_vm2, %v609_v46 }
 0x5cf   :  { %v759_v16 = vpop.f32.mrf.mxu0 }
 0x5d0   :  { %1908 = vmatmul.msk.f32.vlgmr.msrb.gmra.mxu3 %vm195_vm2, %v759_v16 }
 0x5d7   :  { %v762_v47 = vpop.f32.mrf.mxu0 }
 0x5d8   :  { %1909 = vmatmul.msk.f32.gmra.mxu3 %vm195_vm2, %v762_v47 }
 0x5e3   :  { %v455_v48 = vpop.f32.mrf.mxu1 }
 0x5e4   :  { %v485_v51 = vadd.f32 %v2484_v40, %v455_v48  ;;  %v855_v48 = vperm.slane %v2395_v14, 5 }
 0x5eb   :  { %v458_v49 = vpop.f32.mrf.mxu1 }
 0x5ec   :  { %v488_v58 = vadd.f32 %v2488_v43, %v458_v49  ;;  %v810_v43 = vmul.f32 %v2069_v1, %v809_v3 }
 0x5ee   :  { %v811_v4 = vadd.f32 %v2069_v1, %v810_v43 }
 0x5f3   :  { %v635_v50 = vpop.f32.mrf.mxu1 }
 0x5f4   :  { %v641_v52 = vadd.f32 %v635_v50, %v485_v51 }
 0x5fb   :  { %v638_v57 = vpop.f32.mrf.mxu1 }
 0x5fc   :  { %v642_v60 = vadd.f32 %v638_v57, %v488_v58  ;;  %v896_v58 = vld [vmem:[%s2856_s6 + $0x10] sm:$0xff] }
 0x5fd   :  { %923 = vmatpush.msrb.mxu2 %v896_v58 }
 0x653   :  { %v788_v55 = vpop.f32.mrf.mxu3 }
 0x654   :  { %v794_v53 = vadd.f32 %v788_v55, %v641_v52 }
 0x656   :  { %v797_v56 = vadd.f32 %v796_v54, %v794_v53 }
 0x658   :  { %v799_v28 = vadd.f32 %v797_v56, %v2387_v10  ;;  %v2568_v10 = vsel %vm812_vm9, %v2069_v1, %v811_v4  ;;  %v902_v1 = vperm.slane %v2395_v14, 3 }
 0x65a   :  { %v801_v32 = vsel %vm155_vm1, %v799_v28, 0.0 }
 0x65b   :  { %v791_v62 = vpop.f32.mrf.mxu3  ;;  %802 = vadd.xlane.f32.xlu1 %v801_v32  ;;  %v862_v32 = vperm.slane %v2395_v14, 2 }
 0x65c   :  { %v795_v63 = vadd.f32 %v791_v62, %v642_v60  ;;  %v894_v60 = vld [vmem:[%s2856_s6] sm:$0xff] }
 0x65e   :  { %v798_v0 = vadd.f32 %v796_v54, %v795_v63 }
 0x660   :  { %v800_v40 = vadd.f32 %v798_v0, %v2391_v12 }
 0x662   :  { %v804_v39 = vsel %vm155_vm1, %v800_v40, 0.0 }
 0x663   :  { %805 = vadd.xlane.f32.xlu0 %v804_v39 }
 0x6ce   :  { %v803_v6 = vpop.xlane.xlu1 %802 }
 0x6cf   :  { %v814_v7 = vmul.f32 %v2568_v10, %v803_v6 }
 0x6d1   :  { %v816_v8 = vsub.f32 %v799_v28, %v814_v7  ;;  %v895_v28 = vld [vmem:[%s2856_s6 + $0x8] sm:$0xff] }
 0x6d2   :  { %924 = vmatpush.msrb.mxu2 %v895_v28 }
 0x6d3   :  { %v818_v9 = vmul.f32 %v816_v8, %v816_v8 }
 0x6d4   :  { %925 = vmatpush.msrb.mxu2 %v894_v60 }
 0x6d5   :  { %v820_v12 = vsel %vm155_vm1, %v818_v9, 0.0 }
 0x6d6   :  { %821 = vadd.xlane.f32.xlu2 %v820_v12  ;;  %v806_v59 = vpop.xlane.xlu0 %805 }
 0x6d7   :  { %v815_v11 = vmul.f32 %v2568_v10, %v806_v59 }
 0x6d9   :  { %v817_v13 = vsub.f32 %v800_v40, %v815_v11 }
 0x6db   :  { %v819_v15 = vmul.f32 %v817_v13, %v817_v13 }
 0x6dd   :  { %v823_v17 = vsel %vm155_vm1, %v819_v15, 0.0 }
 0x6de   :  { %824 = vadd.xlane.f32.xlu1 %v823_v17 }
 0x749   :  { %v822_v22 = vpop.xlane.xlu2 %821 }
 0x74a   :  { %v826_v23 = vmul.f32 %v822_v22, %v2568_v10  ;;  %v1916_v22 = vld [vmem:[%s2853_s3 + $0x30] sm:$0xff] }
 0x74b   :  { %1012 = vmatpush.msra.mxu0 %v1916_v22 }
 0x74c   :  { %v828_v24 = vadd.f32 1e-05, %v826_v23  ;;  %v1915_v23 = vld [vmem:[%s2853_s3 + $0x28] sm:$0xff] }
 0x74d   :  { %1013 = vmatpush.msra.mxu0 %v1915_v23 }
 0x74e   :  { %2070 = vrsqrt.f32 %v828_v24  ;;  %vm836_vm11 = vweird.f32 %v828_v24 }
 0x751   :  { %v825_v29 = vpop.xlane.xlu1 %824 }
 0x752   :  { %v827_v30 = vmul.f32 %v825_v29, %v2568_v10 }
 0x754   :  { %v2071_v33 = vpop.eup %2070  ;;  %v829_v34 = vadd.f32 1e-05, %v827_v30 }
 0x755   :  { %v831_v36 = vmul.f32 %v2071_v33, %v828_v24  ;;  %vm837_vm10 = vweird.f32 %v2071_v33  ;;  %v1914_v24 = vld [vmem:[%s2853_s3 + $0x20] sm:$0xff] }
 0x756   :  { %2072 = vrsqrt.f32 %v829_v34  ;;  %vm838_vm12 = vmor %vm836_vm11, %vm837_vm10  ;;  %vm846_vm14 = vweird.f32 %v829_v34  ;;  %1014 = vmatpush.msra.mxu0 %v1914_v24 }
 0x757   :  { %v832_v37 = vmul.f32 %v2071_v33, %v831_v36 }
 0x759   :  { %v833_v38 = vmul.f32 0.5, %v832_v37 }
 0x75b   :  { %v834_v41 = vsub.f32 1.5, %v833_v38 }
 0x75c   :  { %v2073_v5 = vpop.eup %2072 }
 0x75d   :  { %v835_v42 = vmul.f32 %v2071_v33, %v834_v41  ;;  %v841_v44 = vmul.f32 %v2073_v5, %v829_v34  ;;  %vm847_vm13 = vweird.f32 %v2073_v5 }
 0x75e   :  { %vm848_vm15 = vmor %vm846_vm14, %vm847_vm13 }
 0x75f   :  { %v839_v46 = vsel %vm838_vm12, %v2071_v33, %v835_v42  ;;  %v842_v16 = vmul.f32 %v2073_v5, %v841_v44  ;;  %v2118_v42 = vld [vmem:[#allocation8] sm:$0xff] }
 0x760   :  { %v850_v47 = vmul.f32 %v839_v46, %v816_v8  ;;  %v979_v44 = vperm.slane %v2118_v42, 6 }
 0x761   :  { %v843_v49 = vmul.f32 0.5, %v842_v16 }
 0x762   :  { %v853_v50 = vmul.f32 %v852_v45, %v850_v47  ;;  %v982_v47 = vperm.slane %v2118_v42, 7 }
 0x763   :  { %v844_v51 = vsub.f32 1.5, %v843_v49 }
 0x764   :  { %v856_v52 = vadd.f32 %v855_v48, %v853_v50 }
 0x765   :  { %v845_v54 = vmul.f32 %v2073_v5, %v844_v51 }
 0x766   :  { %1910 = vmatmul.msk.f32.vlgmr.msrb.gmra.mxu1 %vm155_vm1, %v856_v52 }
 0x767   :  { %v849_v55 = vsel %vm848_vm15, %v2073_v5, %v845_v54 }
 0x768   :  { %v851_v53 = vmul.f32 %v849_v55, %v817_v13 }
 0x76a   :  { %v854_v56 = vmul.f32 %v852_v45, %v851_v53 }
 0x76c   :  { %v857_v57 = vadd.f32 %v855_v48, %v854_v56 }
 0x76e   :  { %1911 = vmatmul.msk.f32.gmra.mxu1 %vm155_vm1, %v857_v57 }
 0x7e3   :  { %v886_v62 = vpop.f32.mrf.mxu1 }
 0x7e4   :  { %v887_v63 = vadd.f32 %v886_v62, %v862_v32 }
 0x7e6   :  { %v892_v0 = vmax.f32 %v887_v63, 0.0 }
 0x7e8   :  { %1912 = vmatmul.msk.f32.vlgmr.msrb.gmra.mxu2 %vm903_vm3, %v892_v0 }
 0x7eb   :  { %v889_v40 = vpop.f32.mrf.mxu1 }
 0x7ec   :  { %v890_v39 = vadd.f32 %v889_v40, %v862_v32 }
 0x7ee   :  { %v893_v19 = vmax.f32 %v890_v39, 0.0 }
 0x7f0   :  { %1913 = vmatmul.msk.f32.gmra.mxu2 %vm903_vm3, %v893_v19 }
 0x86b   :  { %v927_v2 = vpop.f32.mrf.mxu2 }
 0x86c   :  { %v928_v3 = vadd.f32 %v927_v2, %v902_v1 }
 0x86e   :  { %v933_v43 = vadd.f32 %v928_v3, %v856_v52  ;;  %v2667_v3 = vld [vmem:[#allocation5] sm:$0xff] }
 0x870   :  { %v935_v4 = vsel %vm155_vm1, %v933_v43, 0.0 }
 0x871   :  { %936 = vadd.xlane.f32.xlu1 %v935_v4 }
 0x873   :  { %v930_v6 = vpop.f32.mrf.mxu2 }
 0x874   :  { %v931_v7 = vadd.f32 %v930_v6, %v902_v1 }
 0x876   :  { %v934_v8 = vadd.f32 %v931_v7, %v857_v57  ;;  %v2648_v57 = vld [vmem:[#allocation8 + $0x8] sm:$0xff]  ;;  %v2671_v7 = vld [vmem:[#allocation5 + $0x8] sm:$0xff] }
 0x877   :  { %v992_v58 = vperm.slane %v2648_v57, 0 }
 0x878   :  { %v938_v9 = vsel %vm155_vm1, %v934_v8, 0.0 }
 0x879   :  { %939 = vadd.xlane.f32.xlu0 %v938_v9 }
 0x8e4   :  { %v937_v12 = vpop.xlane.xlu1 %936 }
 0x8e5   :  { %v941_v59 = vmul.f32 %v937_v12, %v2568_v10 }
 0x8e7   :  { %v943_v11 = vsub.f32 %v933_v43, %v941_v59 }
 0x8e9   :  { %v945_v13 = vmul.f32 %v943_v11, %v943_v11 }
 0x8eb   :  { %v947_v15 = vsel %vm155_vm1, %v945_v13, 0.0 }
 0x8ec   :  { %v940_v14 = vpop.xlane.xlu0 %939  ;;  %948 = vadd.xlane.f32.xlu1 %v947_v15 }
 0x8ed   :  { %v942_v17 = vmul.f32 %v940_v14, %v2568_v10 }
 0x8ef   :  { %v944_v18 = vsub.f32 %v934_v8, %v942_v17 }
 0x8f1   :  { %v946_v61 = vmul.f32 %v944_v18, %v944_v18 }
 0x8f3   :  { %v950_v20 = vsel %vm155_vm1, %v946_v61, 0.0 }
 0x8f4   :  { %951 = vadd.xlane.f32.xlu0 %v950_v20 }
 0x95f   :  { %v949_v25 = vpop.xlane.xlu1 %948 }
 0x960   :  { %v953_v26 = vmul.f32 %v949_v25, %v2568_v10 }
 0x962   :  { %v955_v27 = vadd.f32 1e-05, %v953_v26 }
 0x964   :  { %2074 = vrsqrt.f32 %v955_v27  ;;  %vm963_vm5 = vweird.f32 %v955_v27 }
 0x967   :  { %v952_v29 = vpop.xlane.xlu0 %951 }
 0x968   :  { %v954_v30 = vmul.f32 %v952_v29, %v2568_v10 }
 0x96a   :  { %v2075_v31 = vpop.eup %2074  ;;  %v956_v33 = vadd.f32 1e-05, %v954_v30 }
 0x96b   :  { %v958_v34 = vmul.f32 %v2075_v31, %v955_v27  ;;  %vm964_vm4 = vweird.f32 %v2075_v31 }
 0x96c   :  { %2076 = vrsqrt.f32 %v956_v33  ;;  %vm965_vm6 = vmor %vm963_vm5, %vm964_vm4  ;;  %vm973_vm8 = vweird.f32 %v956_v33 }
 0x96d   :  { %v959_v35 = vmul.f32 %v2075_v31, %v958_v34 }
 0x96f   :  { %v960_v36 = vmul.f32 0.5, %v959_v35 }
 0x971   :  { %v961_v37 = vsub.f32 1.5, %v960_v36 }
 0x972   :  { %v2077_v38 = vpop.eup %2076 }
 0x973   :  { %v962_v41 = vmul.f32 %v2075_v31, %v961_v37  ;;  %v968_v5 = vmul.f32 %v2077_v38, %v956_v33  ;;  %vm974_vm7 = vweird.f32 %v2077_v38 }
 0x974   :  { %vm975_vm9 = vmor %vm973_vm8, %vm974_vm7 }
 0x975   :  { %v966_v45 = vsel %vm965_vm6, %v2075_v31, %v962_v41  ;;  %v969_v46 = vmul.f32 %v2077_v38, %v968_v5 }
 0x976   :  { %v977_v16 = vmul.f32 %v966_v45, %v943_v11 }
 0x977   :  { %v970_v48 = vmul.f32 0.5, %v969_v46 }
 0x978   :  { %v980_v49 = vmul.f32 %v979_v44, %v977_v16 }
 0x979   :  { %v971_v50 = vsub.f32 1.5, %v970_v48 }
 0x97a   :  { %v2640_v51 = vadd.f32 %v982_v47, %v980_v49 }
 0x97b   :  { %v972_v52 = vmul.f32 %v2077_v38, %v971_v50 }
 0x97c   :  { %1918 = vmatmul.msk.f32.vlgmr.msra.gmra.mxu0 %vm155_vm1, %v2640_v51 }
 0x97d   :  { %v976_v54 = vsel %vm975_vm9, %v2077_v38, %v972_v52 }
 0x97e   :  { %v978_v55 = vmul.f32 %v976_v54, %v944_v18 }
 0x980   :  { %v981_v53 = vmul.f32 %v979_v44, %v978_v55 }
 0x982   :  { %v2644_v56 = vadd.f32 %v982_v47, %v981_v53 }
 0x984   :  { %1919 = vmatmul.msk.f32.gmra.mxu0 %vm155_vm1, %v2644_v56 }
 0x9f9   :  { %v1016_v28 = vpop.f32.mrf.mxu0 }
 0x9fa   :  { %v1017_v60 = vadd.f32 %v1016_v28, %v992_v58 }
 0x9fc   :  { %1029 = vrot.lane.b32.xlu1 %v1017_v60, %s2280_s20 }
 0xa01   :  { %v1019_v32 = vpop.f32.mrf.mxu0 }
 0xa02   :  { %v1020_v62 = vadd.f32 %v1019_v32, %v992_v58 }
 0xa04   :  { %1031 = vrot.lane.b32.xlu2 %v1020_v62, %s2280_s20  ;;  %v2653_v63 = vpack.i.bf16 %v1017_v60, %v1020_v62 }
 0xa06   :  { %2015 = vrot.lane.b32.xlu1 %v2653_v63, %s2281_s21 }
 0xa0e   :  { %1151 = vrot.lane.b32.xlu1 %v1017_v60, %s2285_s25 }
 0xa16   :  { %1147 = vrot.lane.b32.xlu1 %v1017_v60, %s2282_s22 }
 0xa1e   :  { %1333 = vrot.lane.b32.xlu1 %v1020_v62, %s2287_s27 }
 0xa26   :  { %1327 = vrot.lane.b32.xlu1 %v1017_v60, %s2286_s26 }
 0xa2e   :  { %1329 = vrot.lane.b32.xlu1 %v1020_v62, %s2286_s26 }
 0xa36   :  { %1482 = vrot.lane.b32.xlu1 %v1020_v62, %s2284_s7 }
 0xa5e   :  { %v1032_v0 = vpop.permute.xlu2 %1031 }
 0xa5f   :  { %1924 = vmatpush.xpose.msk.msra.mxu3 %vm195_vm2, %v1032_v0 }
 0xa6e   :  { %v1030_v40 = vpop.permute.xlu1 %1029 }
 0xa6f   :  { %1925 = vmatpush.xpose.msk.msra.mxu3 %vm195_vm2, %v1030_v40 }
 0xa72   :  { %1926 = vmatmul.msk.f32.vlgmr.msra.gmra.mxu3 %vm195_vm2, %v1017_v60 }
 0xa78   :  { %v2016_v39 = vpop.permute.xlu1 %2015 }
 0xa79   :  { %v2017_v19 = vunpack.i.l.bf16 %v2016_v39  ;;  %v2018_v1 = vunpack.i.h.bf16 %v2016_v39 }
 0xa7a   :  { %1927 = vmatmul.msk.f32.gmra.mxu3 %vm195_vm2, %v1020_v62 }
 0xa7b   :  { %1138 = vmatpush.msra.mxu1 %v2017_v19 }
 0xa7d   :  { %1139 = vmatpush.msra.mxu1 %v2018_v1 }
 0xa7f   :  { %1319 = vmatpush.msrb.mxu1 %v1920_v21 }
 0xa80   :  { %v1152_v23 = vpop.permute.xlu1 %1151 }
 0xa88   :  { %v1148_v33 = vpop.permute.xlu1 %1147 }
 0xa90   :  { %v1334_v50 = vpop.permute.xlu1 %1333 }
 0xa98   :  { %v1328_v28 = vpop.permute.xlu1 %1327 }
 0xaa0   :  { %v1330_v32 = vpop.permute.xlu1 %1329 }
 0xaf5   :  { %v1058_v2 = vpop.f32.mrf.mxu3 }
 0xaf6   :  { %v1059_v43 = vadd.f32 %v2667_v3, %v1058_v2 }
 0xaf8   :  { %v1064_v4 = vsel %vm119_vm0, %v1059_v43, -inf }
 0xaf9   :  { %1065 = vmax.xlane.f32.xlu0 %v1064_v4  ;;  %v1483_v4 = vpop.permute.xlu1 %1482 }
 0xafd   :  { %v1061_v6 = vpop.f32.mrf.mxu3 }
 0xafe   :  { %v1062_v8 = vadd.f32 %v2671_v7, %v1061_v6 }
 0xb00   :  { %v1067_v9 = vsel %vm119_vm0, %v1062_v8, -inf }
 0xb01   :  { %1068 = vmax.xlane.f32.xlu0 %v1067_v9 }
 0xb6c   :  { %v1066_v12 = vpop.xlane.xlu0 %1065 }
 0xb6d   :  { %v1070_v59 = vsub.f32 %v1059_v43, %v1066_v12 }
 0xb6f   :  { %v1072_v11 = vmul.f32 1.442695, %v1070_v59 }
 0xb71   :  { %2078 = vpow2.f32 %v1072_v11 }
 0xb74   :  { %v1069_v13 = vpop.xlane.xlu0 %1068 }
 0xb75   :  { %v1071_v15 = vsub.f32 %v1062_v8, %v1069_v13 }
 0xb77   :  { %v2079_v14 = vpop.eup %2078  ;;  %v1074_v17 = vmul.f32 1.442695, %v1071_v15 }
 0xb78   :  { %v1076_v18 = vsel %vm119_vm0, %v2079_v14, 0.0 }
 0xb79   :  { %2080 = vpow2.f32 %v1074_v17  ;;  %1077 = vadd.xlane.f32.xlu0 %v1076_v18 }
 0xb7f   :  { %v2081_v61 = vpop.eup %2080 }
 0xb80   :  { %v1079_v20 = vsel %vm119_vm0, %v2081_v61, 0.0 }
 0xb81   :  { %1080 = vadd.xlane.f32.xlu2 %v1079_v20 }
 0xb8d   :  { %1153 = vrot.lane.b32.xlu0 %v1020_v62, %s2285_s25 }
 0xb95   :  { %1149 = vrot.lane.b32.xlu0 %v1020_v62, %s2282_s22 }
 0xb99   :  { %1486 = vrot.lane.b32.xlu2 %v1020_v62, %s2283_s1 }
 0xb9d   :  { %1331 = vrot.lane.b32.xlu0 %v1017_v60, %s2287_s27 }
 0xba5   :  { %1484 = vrot.lane.b32.xlu0 %v1017_v60, %s2283_s1 }
 0xbad   :  { %1480 = vrot.lane.b32.xlu0 %v1017_v60, %s2284_s7 }
 0xbec   :  { %v1078_v22 = vpop.xlane.xlu0 %1077 }
 0xbed   :  { %2082 = vrcp.f32 %v1078_v22  ;;  %v1093_v29 = vand.u32 2147483648, %v1078_v22  ;;  %v1091_v31 = vand.u32 2147483647, %v1078_v22  ;;  %vm1087_vm11 = vweird.f32 %v1078_v22 }
 0xbef   :  { %v1094_v36 = vor.u32 1.1754944e-38, %v1093_v29  ;;  %vm1092_vm13 = vcmp.eq.f32.partialorder %v1091_v31, 8.507059e+37 }
 0xbf3   :  { %v2083_v24 = vpop.eup %2082 }
 0xbf4   :  { %v1083_v25 = vmul.f32 %v2083_v24, %v1078_v22  ;;  %v1081_v26 = vpop.xlane.xlu2 %1080  ;;  %vm1088_vm10 = vweird.f32 %v2083_v24 }
 0xbf5   :  { %2084 = vrcp.f32 %v1081_v26  ;;  %vm1089_vm12 = vmor %vm1087_vm11, %vm1088_vm10  ;;  %v1107_v44 = vand.u32 2147483648, %v1081_v26  ;;  %v1105_v47 = vand.u32 2147483647, %v1081_v26  ;;  %vm1101_vm15 = vweird.f32 %v1081_v26 }
 0xbf6   :  { %v1084_v27 = vsub.f32 1.0, %v1083_v25 }
 0xbf7   :  { %v1108_v49 = vor.u32 1.1754944e-38, %v1107_v44  ;;  %vm1106_vm5 = vcmp.eq.f32.partialorder %v1105_v47, 8.507059e+37 }
 0xbf8   :  { %v1085_v30 = vmul.f32 %v2083_v24, %v1084_v27 }
 0xbfa   :  { %v1086_v34 = vadd.f32 %v2083_v24, %v1085_v30 }
 0xbfb   :  { %v2085_v35 = vpop.eup %2084 }
 0xbfc   :  { %v1090_v37 = vsel %vm1089_vm12, %v2083_v24, %v1086_v34  ;;  %v1097_v38 = vmul.f32 %v2085_v35, %v1081_v26  ;;  %v1487_v16 = vpop.permute.xlu2 %1486  ;;  %vm1102_vm14 = vweird.f32 %v2085_v35 }
 0xbfd   :  { %v1095_v41 = vsel %vm1092_vm13, %v1094_v36, %v1090_v37  ;;  %vm1103_vm4 = vmor %vm1101_vm15, %vm1102_vm14 }
 0xbfe   :  { %v1098_v5 = vsub.f32 1.0, %v1097_v38  ;;  %v1110_v42 = vmul.f32 %v2079_v14, %v1095_v41 }
 0xbff   :  { %v1154_v45 = vpop.permute.xlu0 %1153 }
 0xc00   :  { %v1099_v46 = vmul.f32 %v2085_v35, %v1098_v5  ;;  %1928 = vmatmul.msk.f32.vlgmr.msra.gmra.mxu1 %vm119_vm0, %v1110_v42  ;;  %1930 = vmatpush.xpose.msk.msra.mxu2 %vm195_vm2, %v1154_v45 }
 0xc01   :  { %1948 = vmatpush.xpose.msk.msra.mxu1 %vm195_vm2, %v1487_v16 }
 0xc02   :  { %v1100_v48 = vadd.f32 %v2085_v35, %v1099_v46 }
 0xc04   :  { %1931 = vmatpush.xpose.msk.msra.mxu2 %vm195_vm2, %v1152_v23  ;;  %v1104_v52 = vsel %vm1103_vm4, %v2085_v35, %v1100_v48 }
 0xc05   :  { %v1109_v54 = vsel %vm1106_vm5, %v1108_v49, %v1104_v52 }
 0xc06   :  { %v1111_v55 = vmul.f32 %v2081_v61, %v1109_v54 }
 0xc07   :  { %v1150_v53 = vpop.permute.xlu0 %1149  ;;  %1932 = vmatmul.msk.f32.vlgmr.msra.gmra.mxu2 %vm195_vm2, %v1148_v33 }
 0xc08   :  { %1940 = vmatpush.xpose.msk.msrb.mxu2 %vm195_vm2, %v1334_v50  ;;  %1929 = vmatmul.msk.f32.gmra.mxu1 %vm119_vm0, %v1111_v55 }
 0xc0f   :  { %v1332_v58 = vpop.permute.xlu0 %1331  ;;  %1933 = vmatmul.msk.f32.gmra.mxu2 %vm195_vm2, %v1150_v53 }
 0xc10   :  { %1941 = vmatpush.xpose.msk.msrb.mxu2 %vm195_vm2, %v1332_v58 }
 0xc17   :  { %v1485_v60 = vpop.permute.xlu0 %1484  ;;  %1942 = vmatmul.msk.f32.vlgmr.msrb.gmra.mxu2 %vm195_vm2, %v1328_v28 }
 0xc18   :  { %1949 = vmatpush.xpose.msk.msra.mxu1 %vm195_vm2, %v1485_v60 }
 0xc1f   :  { %1943 = vmatmul.msk.f32.gmra.mxu2 %vm195_vm2, %v1330_v32  ;;  %v1481_v19 = vpop.permute.xlu0 %1480 }
 0xc7d   :  { %v1141_v62 = vpop.f32.mrf.mxu1 }
 0xc7e   :  { %1938 = vmatmul.msk.f32.vlgmr.msrb.gmra.mxu1 %vm195_vm2, %v1141_v62 }
 0xc85   :  { %v1144_v0 = vpop.f32.mrf.mxu1 }
 0xc86   :  { %1939 = vmatmul.msk.f32.gmra.mxu1 %vm195_vm2, %v1144_v0 }
 0xc8a   :  { %v1180_v40 = vpop.f32.mrf.mxu2 }
 0xc8b   :  { %v1181_v39 = vadd.f32 %v2667_v3, %v1180_v40 }
 0xc8d   :  { %v1186_v1 = vsel %vm119_vm0, %v1181_v39, -inf }
 0xc8e   :  { %1187 = vmax.xlane.f32.xlu0 %v1186_v1  ;;  %1950 = vmatmul.msk.f32.vlgmr.msra.gmra.mxu1 %vm195_vm2, %v1481_v19 }
 0xc92   :  { %v1183_v2 = vpop.f32.mrf.mxu2 }
 0xc93   :  { %v1184_v43 = vadd.f32 %v2671_v7, %v1183_v2 }
 0xc95   :  { %v1189_v6 = vsel %vm119_vm0, %v1184_v43, -inf }
 0xc96   :  { %1190 = vmax.xlane.f32.xlu1 %v1189_v6  ;;  %1951 = vmatmul.msk.f32.gmra.mxu1 %vm195_vm2, %v1483_v4 }
 0xc9a   :  { %v1360_v8 = vpop.f32.mrf.mxu2 }
 0xc9b   :  { %v1361_v9 = vadd.f32 %v2667_v3, %v1360_v8 }
 0xc9d   :  { %v1366_v12 = vsel %vm119_vm0, %v1361_v9, -inf }
 0xc9e   :  { %1367 = vmax.xlane.f32.xlu2 %v1366_v12 }
 0xca2   :  { %v1363_v59 = vpop.f32.mrf.mxu2 }
 0xca3   :  { %v1364_v11 = vadd.f32 %v2671_v7, %v1363_v59 }
 0xca5   :  { %v1369_v13 = vsel %vm119_vm0, %v1364_v11, -inf }
 0xca6   :  { %1370 = vmax.xlane.f32.xlu1 %v1369_v13 }
 0xcfb   :  { %v2710_v15 = vpop.f32.mrf.mxu1 }
 0xd01   :  { %v1188_v14 = vpop.xlane.xlu0 %1187 }
 0xd02   :  { %v1192_v18 = vsub.f32 %v1181_v39, %v1188_v14 }
 0xd03   :  { %v2712_v17 = vpop.f32.mrf.mxu1 }
 0xd04   :  { %v1194_v61 = vmul.f32 1.442695, %v1192_v18 }
 0xd06   :  { %2086 = vpow2.f32 %v1194_v61 }
 0xd09   :  { %v1191_v20 = vpop.xlane.xlu1 %1190 }
 0xd0a   :  { %v1193_v21 = vsub.f32 %v1184_v43, %v1191_v20 }
 0xd0b   :  { %v1513_v22 = vpop.f32.mrf.mxu1 }
 0xd0c   :  { %v1196_v23 = vmul.f32 1.442695, %v1193_v21  ;;  %v1514_v24 = vadd.f32 %v2667_v3, %v1513_v22  ;;  %v2716_v29 = vpop.eup %2086 }
 0xd0d   :  { %v1198_v36 = vsel %vm119_vm0, %v2716_v29, 0.0 }
 0xd0e   :  { %2088 = vpow2.f32 %v1196_v23  ;;  %v1519_v25 = vsel %vm119_vm0, %v1514_v24, -inf }
 0xd0f   :  { %1520 = vmax.xlane.f32.xlu0 %v1519_v25 }
 0xd11   :  { %v1368_v26 = vpop.xlane.xlu2 %1367 }
 0xd12   :  { %v1372_v27 = vsub.f32 %v1361_v9, %v1368_v26 }
 0xd13   :  { %v1516_v30 = vpop.f32.mrf.mxu1 }
 0xd14   :  { %v2718_v31 = vpop.eup %2088  ;;  %v1374_v33 = vmul.f32 1.442695, %v1372_v27  ;;  %v1517_v34 = vadd.f32 %v2671_v7, %v1516_v30 }
 0xd15   :  { %v1201_v35 = vsel %vm119_vm0, %v2718_v31, 0.0 }
 0xd16   :  { %2090 = vpow2.f32 %v1374_v33  ;;  %1202 = vadd.xlane.f32.xlu1 %v1201_v35  ;;  %v1522_v3 = vsel %vm119_vm0, %v1517_v34, -inf }
 0xd17   :  { %1523 = vmax.xlane.f32.xlu2 %v1522_v3  ;;  %1199 = vadd.xlane.f32.xlu0 %v1198_v36 }
 0xd19   :  { %v1371_v37 = vpop.xlane.xlu1 %1370 }
 0xd1a   :  { %v1373_v38 = vsub.f32 %v1364_v11, %v1371_v37 }
 0xd1c   :  { %v2726_v41 = vpop.eup %2090  ;;  %v1376_v5 = vmul.f32 1.442695, %v1373_v38 }
 0xd1d   :  { %v1378_v7 = vsel %vm119_vm0, %v2726_v41, 0.0 }
 0xd1e   :  { %2092 = vpow2.f32 %v1376_v5 }
 0xd1f   :  { %1379 = vadd.xlane.f32.xlu2 %v1378_v7 }
 0xd24   :  { %v2730_v42 = vpop.eup %2092 }
 0xd25   :  { %v1381_v44 = vsel %vm119_vm0, %v2730_v42, 0.0 }
 0xd27   :  { %1382 = vadd.xlane.f32.xlu2 %v1381_v44 }
 0xd2b   :  { %2020 = vrot.lane.b32.xlu0 %v2653_v63, %s2288_s0 }
 0xd3f   :  { %2025 = vrot.lane.b32.xlu2 %v2653_v63, %s2289_s28 }
 0xd82   :  { %v1521_v45 = vpop.xlane.xlu0 %1520 }
 0xd83   :  { %v1525_v46 = vsub.f32 %v1514_v24, %v1521_v45 }
 0xd85   :  { %v1527_v16 = vmul.f32 1.442695, %v1525_v46 }
 0xd87   :  { %2094 = vpow2.f32 %v1527_v16 }
 0xd89   :  { %v1203_v47 = vpop.xlane.xlu1 %1202 }
 0xd8a   :  { %2096 = vrcp.f32 %v1203_v47  ;;  %v1524_v48 = vpop.xlane.xlu2 %1523  ;;  %v1200_v49 = vpop.xlane.xlu0 %1199  ;;  %v1229_v20 = vand.u32 2147483648, %v1203_v47  ;;  %vm1223_vm11 = vweird.f32 %v1203_v47  ;;  %v1227_v24 = vand.u32 2147483647, %v1203_v47 }
 0xd8b   :  { %v1526_v50 = vsub.f32 %v1517_v34, %v1524_v48  ;;  %2098 = vrcp.f32 %v1200_v49  ;;  %v1215_v2 = vand.u32 2147483648, %v1200_v49  ;;  %vm1209_vm7 = vweird.f32 %v1200_v49 }
 0xd8c   :  { %v1213_v4 = vand.u32 2147483647, %v1200_v49  ;;  %v1230_v34 = vor.u32 1.1754944e-38, %v1229_v20  ;;  %vm1228_vm13 = vcmp.eq.f32.partialorder %v1227_v24, 8.507059e+37 }
 0xd8d   :  { %v2738_v52 = vpop.eup %2094  ;;  %v1529_v54 = vmul.f32 1.442695, %v1526_v50  ;;  %v1216_v59 = vor.u32 1.1754944e-38, %v1215_v2 }
 0xd8e   :  { %v1531_v55 = vsel %vm119_vm0, %v2738_v52, 0.0  ;;  %vm1214_vm9 = vcmp.eq.f32.partialorder %v1213_v4, 8.507059e+37 }
 0xd8f   :  { %2100 = vpow2.f32 %v1529_v54  ;;  %1532 = vadd.xlane.f32.xlu1 %v1531_v55 }
 0xd90   :  { %v2097_v53 = vpop.eup %2096 }
 0xd91   :  { %v2099_v58 = vpop.eup %2098  ;;  %v1219_v32 = vmul.f32 %v2097_v53, %v1203_v47  ;;  %vm1224_vm10 = vweird.f32 %v2097_v53 }
 0xd92   :  { %v1205_v28 = vmul.f32 %v2099_v58, %v1200_v49  ;;  %v1380_v60 = vpop.xlane.xlu2 %1379  ;;  %vm1210_vm6 = vweird.f32 %v2099_v58  ;;  %vm1225_vm12 = vmor %vm1223_vm11, %vm1224_vm10 }
 0xd93   :  { %2102 = vrcp.f32 %v1380_v60  ;;  %v1220_v19 = vsub.f32 1.0, %v1219_v32  ;;  %vm1211_vm8 = vmor %vm1209_vm7, %vm1210_vm6  ;;  %vm1389_vm15 = vweird.f32 %v1380_v60  ;;  %v1393_v38 = vand.u32 2147483647, %v1380_v60 }
 0xd94   :  { %v1206_v62 = vsub.f32 1.0, %v1205_v28 }
 0xd95   :  { %v2742_v0 = vpop.eup %2100  ;;  %v1221_v8 = vmul.f32 %v2097_v53, %v1220_v19  ;;  %vm1394_vm5 = vcmp.eq.f32.partialorder %v1393_v38, 8.507059e+37 }
 0xd96   :  { %v1207_v40 = vmul.f32 %v2099_v58, %v1206_v62  ;;  %v1534_v39 = vsel %vm119_vm0, %v2742_v0, 0.0 }
 0xd97   :  { %1535 = vadd.xlane.f32.xlu1 %v1534_v39  ;;  %v1222_v61 = vadd.f32 %v2097_v53, %v1221_v8 }
 0xd98   :  { %v1208_v1 = vadd.f32 %v2099_v58, %v1207_v40 }
 0xd99   :  { %v2103_v43 = vpop.eup %2102  ;;  %v1226_v33 = vsel %vm1225_vm12, %v2097_v53, %v1222_v61  ;;  %v1921_v53 = vld [vmem:[%s2854_s4 + $0x28] sm:$0xff] }
 0xd9a   :  { %v1383_v6 = vpop.xlane.xlu2 %1382  ;;  %v1212_v9 = vsel %vm1211_vm8, %v2099_v58, %v1208_v1  ;;  %v1385_v12 = vmul.f32 %v2103_v43, %v1380_v60  ;;  %v1231_v3 = vsel %vm1228_vm13, %v1230_v34, %v1226_v33  ;;  %vm1390_vm14 = vweird.f32 %v2103_v43  ;;  %1290 = vmatpush.msrb.mxu3 %v1921_v53 }
 0xd9b   :  { %2104 = vrcp.f32 %v1383_v6  ;;  %v1217_v13 = vsel %vm1214_vm9, %v1216_v59, %v1212_v9  ;;  %v1233_v5 = vmul.f32 %v2718_v31, %v1231_v3  ;;  %vm1391_vm4 = vmor %vm1389_vm15, %vm1390_vm14  ;;  %v1409_v47 = vand.u32 2147483648, %v1383_v6 }
 0xd9c   :  { %v1386_v18 = vsub.f32 1.0, %v1385_v12  ;;  %v1232_v23 = vmul.f32 %v2716_v29, %v1217_v13  ;;  %v1395_v29 = vand.u32 2147483648, %v1380_v60  ;;  %vm1403_vm7 = vweird.f32 %v1383_v6  ;;  %v1922_v60 = vld [vmem:[%s2854_s4 + $0x30] sm:$0xff] }
 0xd9d   :  { %v2021_v11 = vpop.permute.xlu0 %2020  ;;  %v1407_v49 = vand.u32 2147483647, %v1383_v6  ;;  %v1410_v50 = vor.u32 1.1754944e-38, %v1409_v47  ;;  %1470 = vmatpush.msra.mxu3 %v1922_v60  ;;  %v1957_v60 = vld [vmem:[%s2855_s5 + $0x28] sm:$0xff] }
 0xd9e   :  { %v2022_v14 = vunpack.i.l.bf16 %v2021_v11  ;;  %v2023_v21 = vunpack.i.h.bf16 %v2021_v11  ;;  %v1387_v26 = vmul.f32 %v2103_v43, %v1386_v18  ;;  %v1396_v45 = vor.u32 1.1754944e-38, %v1395_v29 }
 0xd9f   :  { %vm1408_vm9 = vcmp.eq.f32.partialorder %v1407_v49, 8.507059e+37 }
 0xda0   :  { %1260 = vmatpush.msrb.mxu0 %v2022_v14  ;;  %v1388_v36 = vadd.f32 %v2103_v43, %v1387_v26  ;;  %v1923_v26 = vld [vmem:[%s2854_s4 + $0x38] sm:$0xff]  ;;  %s1859_s4 = sshll.u32 %s2859_s9, 4  ;;  %s1860_s4 = int_to_ptr.hbm [resolvable:$true] %s1859_s4 }
 0xda1   :  { %v2105_v22 = vpop.eup %2104 }
 0xda2   :  { %v2026_v25 = vpop.permute.xlu2 %2025  ;;  %1261 = vmatpush.msrb.mxu0 %v2023_v21  ;;  %v1399_v27 = vmul.f32 %v2105_v22, %v1383_v6  ;;  %v1392_v7 = vsel %vm1391_vm4, %v2103_v43, %v1388_v36  ;;  %vm1404_vm6 = vweird.f32 %v2105_v22  ;;  %v1633_v36 = vperm.slane %v2648_v57, 1 }
 0xda3   :  { %v2027_v30 = vunpack.i.l.bf16 %v2026_v25  ;;  %1934 = vmatmul.msk.f32.vlgmr.msrb.gmra.mxu0 %vm119_vm0, %v1232_v23  ;;  %v2028_v35 = vunpack.i.h.bf16 %v2026_v25  ;;  %v1397_v46 = vsel %vm1394_vm5, %v1396_v45, %v1392_v7  ;;  %vm1405_vm8 = vmor %vm1403_vm7, %vm1404_vm6 }
 0xda4   :  { %v1400_v37 = vsub.f32 1.0, %v1399_v27  ;;  %v1412_v48 = vmul.f32 %v2726_v41, %v1397_v46 }
 0xda5   :  { %1440 = vmatpush.msra.mxu0 %v2027_v30 }
 0xda6   :  { %v1401_v44 = vmul.f32 %v2105_v22, %v1400_v37 }
 0xda7   :  { %1441 = vmatpush.msra.mxu0 %v2028_v35 }
 0xda8   :  { %v1402_v16 = vadd.f32 %v2105_v22, %v1401_v44 }
 0xda9   :  { %1623 = vmatpush.msrb.mxu0 %v1923_v26 }
 0xdaa   :  { %v1406_v31 = vsel %vm1405_vm8, %v2105_v22, %v1402_v16 }
 0xdab   :  { %1935 = vmatmul.msk.f32.gmra.mxu0 %vm119_vm0, %v1233_v5  ;;  %v1411_v54 = vsel %vm1408_vm9, %v1410_v50, %v1406_v31 }
 0xdac   :  { %v1413_v55 = vmul.f32 %v2730_v42, %v1411_v54 }
 0xdb0   :  { %2030 = vrot.lane.b32.xlu1 %v2653_v63, %s2290_s29 }
 0xdb3   :  { %1944 = vmatmul.msk.f32.vlgmr.msra.gmra.mxu0 %vm119_vm0, %v1412_v48 }
 0xdbb   :  { %1945 = vmatmul.msk.f32.gmra.mxu0 %vm119_vm0, %v1413_v55 }
 0xe02   :  { %v1533_v63 = vpop.xlane.xlu1 %1532 }
 0xe03   :  { %2106 = vrcp.f32 %v1533_v63  ;;  %v1548_v1 = vand.u32 2147483648, %v1533_v63  ;;  %vm1542_vm11 = vweird.f32 %v1533_v63  ;;  %v1546_v2 = vand.u32 2147483647, %v1533_v63 }
 0xe05   :  { %v1549_v8 = vor.u32 1.1754944e-38, %v1548_v1  ;;  %vm1547_vm13 = vcmp.eq.f32.partialorder %v1546_v2, 8.507059e+37  ;;  %v1967_v1 = vld [vmem:[%s2856_s6 + $0x68] sm:$0xff] }
 0xe09   :  { %v2107_v58 = vpop.eup %2106 }
 0xe0a   :  { %v1536_v41 = vpop.xlane.xlu1 %1535  ;;  %v1538_v28 = vmul.f32 %v2107_v58, %v1533_v63  ;;  %vm1543_vm10 = vweird.f32 %v2107_v58 }
 0xe0b   :  { %2108 = vrcp.f32 %v1536_v41  ;;  %vm1544_vm12 = vmor %vm1542_vm11, %vm1543_vm10  ;;  %v1562_v13 = vand.u32 2147483648, %v1536_v41  ;;  %vm1556_vm15 = vweird.f32 %v1536_v41  ;;  %v1560_v61 = vand.u32 2147483647, %v1536_v41 }
 0xe0c   :  { %v1539_v32 = vsub.f32 1.0, %v1538_v28  ;;  %v1958_v28 = vld [vmem:[%s2855_s5 + $0x30] sm:$0xff] }
 0xe0d   :  { %v1563_v22 = vor.u32 1.1754944e-38, %v1562_v13  ;;  %vm1561_vm5 = vcmp.eq.f32.partialorder %v1560_v61, 8.507059e+37 }
 0xe0e   :  { %v1540_v62 = vmul.f32 %v2107_v58, %v1539_v32  ;;  %v1956_v32 = vld [vmem:[%s2855_s5 + $0x20] sm:$0xff] }
 0xe10   :  { %v1541_v39 = vadd.f32 %v2107_v58, %v1540_v62 }
 0xe11   :  { %v2109_v42 = vpop.eup %2108 }
 0xe12   :  { %v1552_v40 = vmul.f32 %v2109_v42, %v1536_v41  ;;  %v1545_v43 = vsel %vm1544_vm12, %v2107_v58, %v1541_v39  ;;  %vm1557_vm14 = vweird.f32 %v2109_v42  ;;  %v1969_v39 = vld [vmem:[%s2856_s6 + $0x78] sm:$0xff] }
 0xe13   :  { %v1550_v12 = vsel %vm1547_vm13, %v1549_v8, %v1545_v43  ;;  %vm1558_vm4 = vmor %vm1556_vm15, %vm1557_vm14  ;;  %1749 = vmatpush.msrb.mxu1 %v1969_v39  ;;  %v1816_v39 = vld [vmem:[#allocation10] sm:$0xff] }
 0xe14   :  { %v1553_v19 = vsub.f32 1.0, %v1552_v40  ;;  %v1565_v18 = vmul.f32 %v2738_v52, %v1550_v12 }
 0xe16   :  { %v1554_v4 = vmul.f32 %v2109_v42, %v1553_v19  ;;  %v1968_v19 = vld [vmem:[%s2856_s6 + $0x70] sm:$0xff] }
 0xe17   :  { %1750 = vmatpush.msrb.mxu1 %v1968_v19 }
 0xe18   :  { %v1555_v11 = vadd.f32 %v2109_v42, %v1554_v4  ;;  %v1966_v4 = vld [vmem:[%s2856_s6 + $0x60] sm:$0xff] }
 0xe19   :  { %1751 = vmatpush.msrb.mxu1 %v1967_v1 }
 0xe1a   :  { %v1559_v21 = vsel %vm1558_vm4, %v2109_v42, %v1555_v11 }
 0xe1b   :  { %v1564_v23 = vsel %vm1561_vm5, %v1563_v22, %v1559_v21  ;;  %1752 = vmatpush.msrb.mxu1 %v1966_v4 }
 0xe1c   :  { %v1566_v24 = vmul.f32 %v2742_v0, %v1564_v23 }
 0xe20   :  { %v1263_v6 = vpop.f32.mrf.mxu0 }
 0xe21   :  { %1936 = vmatmul.msk.f32.vlgmr.msrb.gmra.mxu3 %vm195_vm2, %v1263_v6 }
 0xe22   :  { %v2031_v9 = vpop.permute.xlu1 %2030 }
 0xe23   :  { %v2032_v59 = vunpack.i.l.bf16 %v2031_v9  ;;  %v2033_v14 = vunpack.i.h.bf16 %v2031_v9  ;;  %v1965_v9 = vld [vmem:[%s2856_s6 + $0x58] sm:$0xff] }
 0xe24   :  { %1753 = vmatpush.msrb.mxu1 %v1965_v9 }
 0xe25   :  { %1593 = vmatpush.msra.mxu2 %v2032_v59 }
 0xe27   :  { %1594 = vmatpush.msra.mxu2 %v2033_v14 }
 0xe28   :  { %v1266_v20 = vpop.f32.mrf.mxu0  ;;  %1952 = vmatmul.msk.f32.vlgmr.msra.gmra.mxu2 %vm119_vm0, %v1565_v18 }
 0xe29   :  { %1937 = vmatmul.msk.f32.gmra.mxu3 %vm195_vm2, %v1266_v20  ;;  %v1682_v20 = vperm.slane %v2648_v57, 4 }
 0xe30   :  { %v1443_v25 = vpop.f32.mrf.mxu0  ;;  %1953 = vmatmul.msk.f32.gmra.mxu2 %vm119_vm0, %v1566_v24  ;;  %v1685_v24 = vperm.slane %v2648_v57, 5 }
 0xe31   :  { %1946 = vmatmul.msk.f32.vlgmr.msra.gmra.mxu3 %vm195_vm2, %v1443_v25 }
 0xe38   :  { %v1446_v52 = vpop.f32.mrf.mxu0 }
 0xe39   :  { %1947 = vmatmul.msk.f32.gmra.mxu3 %vm195_vm2, %v1446_v52 }
 0xea4   :  { %v1292_v0 = vpop.f32.mrf.mxu3 }
 0xea5   :  { %v1322_v35 = vadd.f32 %v2710_v15, %v1292_v0 }
 0xeab   :  { %v1596_v27 = vpop.f32.mrf.mxu2 }
 0xeac   :  { %1954 = vmatmul.msk.f32.vlgmr.msrb.gmra.mxu0 %vm195_vm2, %v1596_v27  ;;  %v1295_v33 = vpop.f32.mrf.mxu3 }
 0xead   :  { %v1325_v7 = vadd.f32 %v2712_v17, %v1295_v33 }
 0xeb3   :  { %v1599_v30 = vpop.f32.mrf.mxu2 }
 0xeb4   :  { %1955 = vmatmul.msk.f32.gmra.mxu0 %vm195_vm2, %v1599_v30  ;;  %v1472_v34 = vpop.f32.mrf.mxu3 }
 0xeb5   :  { %v1478_v3 = vadd.f32 %v1472_v34, %v1322_v35 }
 0xebc   :  { %v1475_v5 = vpop.f32.mrf.mxu3 }
 0xebd   :  { %v1479_v45 = vadd.f32 %v1475_v5, %v1325_v7 }
 0xf29   :  { %v1625_v37 = vpop.f32.mrf.mxu0 }
 0xf2a   :  { %v1631_v29 = vadd.f32 %v1625_v37, %v1478_v3  ;;  %v1964_v3 = vld [vmem:[%s2856_s6 + $0x50] sm:$0xff]  ;;  %v1962_v37 = vld [vmem:[%s2856_s6 + $0x40] sm:$0xff] }
 0xf2b   :  { %1754 = vmatpush.msrb.mxu1 %v1964_v3 }
 0xf2c   :  { %v1634_v38 = vadd.f32 %v1633_v36, %v1631_v29  ;;  %v1693_v29 = vperm.slane %v2648_v57, 2 }
 0xf2e   :  { %v1636_v44 = vadd.f32 %v1634_v38, %v2640_v51 }
 0xf30   :  { %v1638_v46 = vsel %vm155_vm1, %v1636_v44, 0.0 }
 0xf31   :  { %v1628_v16 = vpop.f32.mrf.mxu0  ;;  %1639 = vadd.xlane.f32.xlu0 %v1638_v46 }
 0xf32   :  { %v1632_v47 = vadd.f32 %v1628_v16, %v1479_v45  ;;  %v1734_v16 = vperm.slane %v2648_v57, 3 }
 0xf34   :  { %v1635_v48 = vadd.f32 %v1633_v36, %v1632_v47  ;;  %v1963_v36 = vld [vmem:[%s2856_s6 + $0x48] sm:$0xff]  ;;  %s2292_s6 = smov [#allocation11]  }
 0xf35   :  { %1755 = vmatpush.msrb.mxu1 %v1963_v36  ;;  %s1857_s7 = sshll.u32 %s2292_s6, 4  ;;  %s1858_s7 = int_to_ptr.vmem [resolvable:$true] %s1857_s7 }
 0xf36   :  { %v1637_v15 = vadd.f32 %v1635_v48, %v2644_v56  ;;  %v1959_v56 = vld [vmem:[%s2855_s5 + $0x38] sm:$0xff] }
 0xf37   :  { %1712 = vmatpush.msrb.mxu3 %v1959_v56  ;;  %1756 = vmatpush.msrb.mxu1 %v1962_v37 }
 0xf38   :  { %v1641_v49 = vsel %vm155_vm1, %v1637_v15, 0.0 }
 0xf39   :  { %1642 = vadd.xlane.f32.xlu2 %v1641_v49  ;;  %1713 = vmatpush.msrb.mxu3 %v1958_v28 }
 0xf3b   :  { %1714 = vmatpush.msrb.mxu3 %v1957_v60 }
 0xf3d   :  { %1715 = vmatpush.msrb.mxu3 %v1956_v32 }
 0xfa4   :  { %v1640_v31 = vpop.xlane.xlu0 %1639 }
 0xfa5   :  { %v1644_v50 = vmul.f32 %v1640_v31, %v2568_v10 }
 0xfa7   :  { %v1646_v54 = vsub.f32 %v1636_v44, %v1644_v50 }
 0xfa9   :  { %v1648_v55 = vmul.f32 %v1646_v54, %v1646_v54 }
 0xfab   :  { %v1650_v17 = vsel %vm155_vm1, %v1648_v55, 0.0 }
 0xfac   :  { %1651 = vadd.xlane.f32.xlu1 %v1650_v17  ;;  %v1643_v51 = vpop.xlane.xlu2 %1642 }
 0xfad   :  { %v1645_v53 = vmul.f32 %v1643_v51, %v2568_v10 }
 0xfaf   :  { %v1647_v63 = vsub.f32 %v1637_v15, %v1645_v53 }
 0xfb1   :  { %v1649_v41 = vmul.f32 %v1647_v63, %v1647_v63 }
 0xfb3   :  { %v1653_v58 = vsel %vm155_vm1, %v1649_v41, 0.0 }
 0xfb4   :  { %1654 = vadd.xlane.f32.xlu0 %v1653_v58 }
0x101f   :  { %v1652_v42 = vpop.xlane.xlu1 %1651 }
0x1020   :  { %v1656_v62 = vmul.f32 %v1652_v42, %v2568_v10  ;;  %v1819_v42 = vld [vmem:[#allocation10 + $0x18] sm:$0xff] }
0x1021   :  { %1840 = vmatpush.msrb.mxu2 %v1819_v42 }
0x1022   :  { %v1658_v40 = vadd.f32 1e-05, %v1656_v62  ;;  %v1818_v62 = vld [vmem:[#allocation10 + $0x10] sm:$0xff] }
0x1023   :  { %1841 = vmatpush.msrb.mxu2 %v1818_v62 }
0x1024   :  { %2110 = vrsqrt.f32 %v1658_v40  ;;  %vm1666_vm2 = vweird.f32 %v1658_v40 }
0x1027   :  { %v1655_v2 = vpop.xlane.xlu0 %1654 }
0x1028   :  { %v1657_v43 = vmul.f32 %v1655_v2, %v2568_v10 }
0x102a   :  { %v2111_v6 = vpop.eup %2110  ;;  %v1659_v8 = vadd.f32 1e-05, %v1657_v43 }
0x102b   :  { %v1661_v12 = vmul.f32 %v2111_v6, %v1658_v40  ;;  %vm1667_vm0 = vweird.f32 %v2111_v6  ;;  %v1817_v40 = vld [vmem:[#allocation10 + $0x8] sm:$0xff] }
0x102c   :  { %2112 = vrsqrt.f32 %v1659_v8  ;;  %vm1668_vm6 = vmor %vm1666_vm2, %vm1667_vm0  ;;  %vm1676_vm8 = vweird.f32 %v1659_v8  ;;  %1842 = vmatpush.msrb.mxu2 %v1817_v40 }
0x102d   :  { %v1662_v59 = vmul.f32 %v2111_v6, %v1661_v12 }
0x102e   :  { %1843 = vmatpush.msrb.mxu2 %v1816_v39 }
0x102f   :  { %v1663_v11 = vmul.f32 0.5, %v1662_v59 }
0x1031   :  { %v1664_v13 = vsub.f32 1.5, %v1663_v11 }
0x1032   :  { %v2113_v14 = vpop.eup %2112 }
0x1033   :  { %v1665_v18 = vmul.f32 %v2111_v6, %v1664_v13  ;;  %v1671_v61 = vmul.f32 %v2113_v14, %v1659_v8  ;;  %vm1677_vm7 = vweird.f32 %v2113_v14 }
0x1034   :  { %vm1678_vm9 = vmor %vm1676_vm8, %vm1677_vm7 }
0x1035   :  { %v1669_v21 = vsel %vm1668_vm6, %v2111_v6, %v1665_v18  ;;  %v1672_v22 = vmul.f32 %v2113_v14, %v1671_v61  ;;  %v1810_v61 = vperm.slane %v2648_v57, 6 }
0x1036   :  { %v1680_v23 = vmul.f32 %v1669_v21, %v1646_v54 }
0x1037   :  { %v1673_v25 = vmul.f32 0.5, %v1672_v22 }
0x1038   :  { %v1683_v52 = vmul.f32 %v1682_v20, %v1680_v23 }
0x1039   :  { %v1674_v26 = vsub.f32 1.5, %v1673_v25 }
0x103a   :  { %v1686_v27 = vadd.f32 %v1685_v24, %v1683_v52 }
0x103b   :  { %v1675_v30 = vmul.f32 %v2113_v14, %v1674_v26 }
0x103c   :  { %1960 = vmatmul.msk.f32.vlgmr.msrb.gmra.mxu3 %vm155_vm1, %v1686_v27 }
0x103d   :  { %v1679_v0 = vsel %vm1678_vm9, %v2113_v14, %v1675_v30 }
0x103e   :  { %v1681_v33 = vmul.f32 %v1679_v0, %v1647_v63 }
0x1040   :  { %v1684_v34 = vmul.f32 %v1682_v20, %v1681_v33 }
0x1042   :  { %v1687_v35 = vadd.f32 %v1685_v24, %v1684_v34  ;;  %v2035_v34 = vld [vmem:[#allocation10 + $0x20] ss:$0 sm:$0xff] }
0x1044   :  { %1961 = vmatmul.msk.f32.gmra.mxu3 %vm155_vm1, %v1687_v35 }
0x10bf   :  { %v1717_v38 = vpop.f32.mrf.mxu3 }
0x10c0   :  { %v1718_v5 = vadd.f32 %v1717_v38, %v1693_v29 }
0x10c2   :  { %v1723_v7 = vmax.f32 %v1718_v5, 0.0 }
0x10c4   :  { %1970 = vmatmul.msk.f32.vlgmr.msrb.gmra.mxu1 %vm903_vm3, %v1723_v7 }
0x10c7   :  { %v1720_v44 = vpop.f32.mrf.mxu3 }
0x10c8   :  { %v1721_v45 = vadd.f32 %v1720_v44, %v1693_v29 }
0x10ca   :  { %v1724_v46 = vmax.f32 %v1721_v45, 0.0 }
0x10cc   :  { %1971 = vmatmul.msk.f32.gmra.mxu1 %vm903_vm3, %v1724_v46 }
0x1141   :  { %v1758_v47 = vpop.f32.mrf.mxu1 }
0x1142   :  { %v1759_v48 = vadd.f32 %v1758_v47, %v1734_v16 }
0x1144   :  { %v1764_v15 = vadd.f32 %v1759_v48, %v1686_v27 }
0x1146   :  { %v1766_v49 = vsel %vm155_vm1, %v1764_v15, 0.0 }
0x1147   :  { %1767 = vadd.xlane.f32.xlu0 %v1766_v49 }
0x1149   :  { %v1761_v31 = vpop.f32.mrf.mxu1 }
0x114a   :  { %v1762_v50 = vadd.f32 %v1761_v31, %v1734_v16 }
0x114c   :  { %v1765_v54 = vadd.f32 %v1762_v50, %v1687_v35 }
0x114e   :  { %v1769_v55 = vsel %vm155_vm1, %v1765_v54, 0.0 }
0x114f   :  { %1770 = vadd.xlane.f32.xlu0 %v1769_v55 }
0x11ba   :  { %v1768_v17 = vpop.xlane.xlu0 %1767 }
0x11bb   :  { %v1772_v51 = vmul.f32 %v1768_v17, %v2568_v10 }
0x11bd   :  { %v1774_v53 = vsub.f32 %v1764_v15, %v1772_v51 }
0x11bf   :  { %v1776_v63 = vmul.f32 %v1774_v53, %v1774_v53 }
0x11c1   :  { %v1778_v41 = vsel %vm155_vm1, %v1776_v63, 0.0 }
0x11c2   :  { %1779 = vadd.xlane.f32.xlu2 %v1778_v41  ;;  %v1771_v58 = vpop.xlane.xlu0 %1770 }
0x11c3   :  { %v1773_v56 = vmul.f32 %v1771_v58, %v2568_v10 }
0x11c5   :  { %v1775_v28 = vsub.f32 %v1765_v54, %v1773_v56 }
0x11c7   :  { %v1777_v60 = vmul.f32 %v1775_v28, %v1775_v28 }
0x11c9   :  { %v1781_v32 = vsel %vm155_vm1, %v1777_v60, 0.0 }
0x11ca   :  { %1782 = vadd.xlane.f32.xlu0 %v1781_v32 }
0x1235   :  { %v1780_v19 = vpop.xlane.xlu2 %1779 }
0x1236   :  { %v1784_v1 = vmul.f32 %v1780_v19, %v2568_v10 }
0x1238   :  { %v1786_v2 = vadd.f32 1e-05, %v1784_v1 }
0x123a   :  { %2114 = vrsqrt.f32 %v1786_v2  ;;  %vm1794_vm10 = vweird.f32 %v1786_v2 }
0x123d   :  { %v1783_v43 = vpop.xlane.xlu0 %1782 }
0x123e   :  { %v1785_v4 = vmul.f32 %v1783_v43, %v2568_v10  ;;  %v1813_v10 = vperm.slane %v2648_v57, 7 }
0x1240   :  { %v2115_v6 = vpop.eup %2114  ;;  %v1787_v8 = vadd.f32 1e-05, %v1785_v4 }
0x1241   :  { %v1789_v9 = vmul.f32 %v2115_v6, %v1786_v2  ;;  %vm1795_vm3 = vweird.f32 %v2115_v6 }
0x1242   :  { %2116 = vrsqrt.f32 %v1787_v8  ;;  %vm1796_vm11 = vmor %vm1794_vm10, %vm1795_vm3  ;;  %vm1804_vm13 = vweird.f32 %v1787_v8 }
0x1243   :  { %v1790_v12 = vmul.f32 %v2115_v6, %v1789_v9 }
0x1245   :  { %v1791_v59 = vmul.f32 0.5, %v1790_v12 }
0x1247   :  { %v1792_v11 = vsub.f32 1.5, %v1791_v59 }
0x1248   :  { %v2117_v13 = vpop.eup %2116 }
0x1249   :  { %v1793_v14 = vmul.f32 %v2115_v6, %v1792_v11  ;;  %v1799_v18 = vmul.f32 %v2117_v13, %v1787_v8  ;;  %vm1805_vm12 = vweird.f32 %v2117_v13 }
0x124a   :  { %vm1806_vm14 = vmor %vm1804_vm13, %vm1805_vm12 }
0x124b   :  { %v1797_v20 = vsel %vm1796_vm11, %v2115_v6, %v1793_v14  ;;  %v1800_v21 = vmul.f32 %v2117_v13, %v1799_v18 }
0x124c   :  { %v1808_v22 = vmul.f32 %v1797_v20, %v1774_v53 }
0x124d   :  { %v1801_v23 = vmul.f32 0.5, %v1800_v21 }
0x124e   :  { %v1811_v24 = vmul.f32 %v1810_v61, %v1808_v22 }
0x124f   :  { %v1802_v25 = vsub.f32 1.5, %v1801_v23 }
0x1250   :  { %v1814_v52 = vadd.f32 %v1813_v10, %v1811_v24 }
0x1251   :  { %v1803_v26 = vmul.f32 %v2117_v13, %v1802_v25 }
0x1252   :  { %1972 = vmatmul.msk.f32.vlgmr.msrb.gmra.mxu2 %vm155_vm1, %v1814_v52 }
0x1253   :  { %v1807_v27 = vsel %vm1806_vm14, %v2117_v13, %v1803_v26 }
0x1254   :  { %v1809_v30 = vmul.f32 %v1807_v27, %v1775_v28 }
0x1256   :  { %v1812_v0 = vmul.f32 %v1810_v61, %v1809_v30 }
0x1258   :  { %v1815_v33 = vadd.f32 %v1813_v10, %v1812_v0 }
0x125a   :  { %1973 = vmatmul.msk.f32.gmra.mxu2 %vm155_vm1, %v1815_v33 }
0x12d5   :  { %v1845_v35 = vpop.f32.mrf.mxu2 }
0x12d6   :  { %v1846_v3 = vadd.f32 %v2035_v34, %v1845_v35 }
0x12d8   :  { %1851 = vst [vmem:[#allocation11] sm:$0xff] %v1846_v3 }
0x12dd   :  { %v1848_v57 = vpop.f32.mrf.mxu2 }
0x12de   :  { %v1849_v36 = vadd.f32 %v2035_v34, %v1848_v57 }
0x12e0   :  { %1852 = vst [vmem:[#allocation11 + $0x8] sm:$0xff] %v1849_v36 }
0x12e1   :  { %1865 = dma.vmem_to_hbm [thread:$0]  %s1858_s7, 256, %s1860_s4, [#allocation4], %s2274_s17, %s2274_s17, %s2275_s18  }
0x12e2   :  { %2271 = dma.done.wait [#allocation4], 256  }
0x12e3   :  { %2272 = vsyncadd [#allocation4], 4294967040 }
0x12e4   :  { %1870 = vsyncpa [#allocation3], 1 }
0x12e5   :  { %1871 = vsyncpa [#allocation6], 1 }
0x12e6   :  { %1872 = vsyncpa [#allocation9], 1 }
0x12e7   :  { %1873 = vsyncpa [#allocation4], 1 }

</bundles_post_ra>
